<compile_context>
chip_gen: v7x
topology: tpu7x:2x2x1
jax: 0.10.0
libtpu: 0.0.40
codegen_flags: <defaults>
</compile_context>

<pallas_src>
import functools

import numpy as np
import jax
import jax.numpy as jnp
from jax.experimental import pallas as pl
from jax.experimental.pallas import tpu as pltpu


D = 768       # hidden size hard-coded in the PyTorch model
H = 4         # heads (both MultiheadAttention and GATConv)
QTOK = 16     # per-node token count hard-coded via reshape(-1, 16*768)


# ----------------------------------------------------------------------------
# Pallas kernel 1: tiled matmul + bias (+ optional fused ReLU).
# The f32 output block itself is the accumulator (resident across the k axis).
# ----------------------------------------------------------------------------
def _matmul_kernel(a_ref, b_ref, bias_ref, o_ref, *, apply_relu, single_k):
    a = a_ref[...]
    b = b_ref[...]
    if b.dtype == jnp.bfloat16 and a.dtype != jnp.bfloat16:
        a = a.astype(jnp.bfloat16)      # native bf16 MXU path; accumulate in f32
    part = jnp.dot(a, b, preferred_element_type=jnp.float32)

    if single_k:
        out = part + bias_ref[...]
        if apply_relu:
            out = jnp.maximum(out, 0.0)
        o_ref[...] = out
    else:
        k = pl.program_id(1)

        @pl.when(k == 0)
        def _():
            o_ref[...] = jnp.zeros_like(o_ref)

        o_ref[...] += part

        @pl.when(k == pl.num_programs(1) - 1)
        def _():
            out = o_ref[...] + bias_ref[...]
            if apply_relu:
                out = jnp.maximum(out, 0.0)
            o_ref[...] = out


def _choose_tiles(K, N, itemsize):
    # Small projection weights (<= 8 MiB) run as a single grid step: with only
    # 4..64 output rows these linears are launch/step-overhead bound.
    if K * N * itemsize <= (8 << 20):
        return K, N
    # Heavy, HBM-bandwidth-bound weights: large tiles, ~4 MiB per B buffer so
    # that double-buffering fits v7x's 64 MiB VMEM as well as v5e/v6e.
    tk = K
    for cand in (2048, 1024, 512, 256, 128):
        if K % cand == 0:
            tk = cand
            break
    tn = N
    for cand in (1024, 512, 256, 128):
        if N % cand == 0:
            tn = cand
            break
    while tk * tn * itemsize > (4 << 20) and tk % 2 == 0 and tk > 256:
        tk //= 2
    return tk, tn


def linear(a, w_t, bias=None, apply_relu=False):
    """Computes a @ w_t + bias.  a: (M, K) f32; w_t: (K, N) f32|bf16; bias: (N,)."""
    M, K = a.shape
    K2, N = w_t.shape
    assert K == K2, (a.shape, w_t.shape)
    if bias is None:
        bias = jnp.zeros((N,), dtype=jnp.float32)
    bias2 = bias.reshape(1, N).astype(jnp.float32)
    tk, tn = _choose_tiles(K, N, jnp.dtype(w_t.dtype).itemsize)
    kernel = functools.partial(_matmul_kernel, apply_relu=apply_relu,
                               single_k=(tk == K))
    return pl.pallas_call(
        kernel,
        out_shape=jax.ShapeDtypeStruct((M, N), jnp.float32),
        grid_spec=pltpu.PrefetchScalarGridSpec(
            num_scalar_prefetch=0,
            grid=(N // tn, K // tk),
            in_specs=[
                pl.BlockSpec((M, tk), lambda j, k: (0, k)),
                pl.BlockSpec((tk, tn), lambda j, k: (k, j)),
                pl.BlockSpec((1, tn), lambda j, k: (0, j)),
            ],
            out_specs=pl.BlockSpec((M, tn), lambda j, k: (0, j)),
        ),
        compiler_params=pltpu.CompilerParams(
            dimension_semantics=("parallel", "arbitrary")),
    )(a, w_t, bias2)


# ----------------------------------------------------------------------------
# Pallas kernel 2: fused scaled-dot-product attention, heads batched per step.
# ----------------------------------------------------------------------------
def _mha_attn_kernel(q_ref, k_ref, v_ref, o_ref, *, scale):
    q = q_ref[...].astype(jnp.float32)      # (bh_blk, Lq, Dh)
    k = k_ref[...].astype(jnp.float32)      # (bh_blk, Lk, Dh)
    v = v_ref[...].astype(jnp.float32)
    s = jnp.einsum('bqd,bkd->bqk', q, k,
                   preferred_element_type=jnp.float32) * scale
    s = s - jnp.max(s, axis=-1, keepdims=True)
    p = jnp.exp(s)
    p = p * pl.reciprocal(jnp.sum(p, axis=-1, keepdims=True), approx=True)
    o_ref[...] = jnp.einsum('bqk,bkd->bqd', p, v,
                            preferred_element_type=jnp.float32).astype(o_ref.dtype)


def mha_attention(q, k, v):
    """q: (BH, Lq, Dh); k, v: (BH, Lk, Dh). Returns softmax(qk^T/sqrt(Dh)) v."""
    BH, Lq, Dh = q.shape
    _, Lk, _ = k.shape
    scale = 1.0 / float(np.sqrt(Dh))
    G = 2 if (BH % 2 == 0) else 1     # 2-wide parallel axis keeps both v7x TCs busy
    blk = BH // G
    kernel = functools.partial(_mha_attn_kernel, scale=scale)
    return pl.pallas_call(
        kernel,
        out_shape=jax.ShapeDtypeStruct((BH, Lq, Dh), q.dtype),
        grid_spec=pltpu.PrefetchScalarGridSpec(
            num_scalar_prefetch=0,
            grid=(G,),
            in_specs=[
                pl.BlockSpec((blk, Lq, Dh), lambda b: (b, 0, 0)),
                pl.BlockSpec((blk, Lk, Dh), lambda b: (b, 0, 0)),
                pl.BlockSpec((blk, Lk, Dh), lambda b: (b, 0, 0)),
            ],
            out_specs=pl.BlockSpec((blk, Lq, Dh), lambda b: (b, 0, 0)),
        ),
        compiler_params=pltpu.CompilerParams(
            dimension_semantics=("parallel",)),
    )(q, k, v)


# ----------------------------------------------------------------------------
# Pallas kernel 3: dense GATConv attention, heads batched per step; self-loops
# included in the adjacency mask.  Dropout(0.6) on attention coefficients is a
# training-time op and the identity at inference, so it is omitted.
# ----------------------------------------------------------------------------
def _gat_attn_kernel(xp_ref, asrc_ref, adst_ref, adj_ref, bias_ref, o_ref, *,
                     negative_slope):
    xp = xp_ref[...].astype(jnp.float32)                        # (Hb, N, C)
    asrc = asrc_ref[...].astype(jnp.float32)                    # (Hb, 1, C)
    adst = adst_ref[...].astype(jnp.float32)                    # (Hb, 1, C)
    a_src_row = jnp.einsum('hxc,hnc->hxn', asrc, xp,
                           preferred_element_type=jnp.float32)  # (Hb, 1, N)
    a_dst_col = jnp.einsum('hnc,hxc->hnx', xp, adst,
                           preferred_element_type=jnp.float32)  # (Hb, N, 1)
    e = a_dst_col + a_src_row                                   # e[h,i,j]=dst_i+src_j
    e = jnp.where(e > 0, e, negative_slope * e)                 # leaky_relu
    adj = adj_ref[...]
    e = jnp.where(adj[None, :, :] > 0, e, -1e30)                # mask non-edges
    e = e - jnp.max(e, axis=-1, keepdims=True)
    p = jnp.exp(e)
    p = p * pl.reciprocal(jnp.sum(p, axis=-1, keepdims=True), approx=True)
    out = jnp.einsum('hij,hjc->hic', p, xp,
                     preferred_element_type=jnp.float32) + bias_ref[...]
    o_ref[...] = out.astype(o_ref.dtype)


def gat_attention(xp, att_src, att_dst, adj, bias):
    """xp: (H, N, C); att_src/att_dst/bias: (H, 1, C); adj: (N, N) -> (H, N, C)."""
    Hh, N, C = xp.shape
    Gh = 2 if (Hh % 2 == 0) else 1
    hb = Hh // Gh
    kernel = functools.partial(_gat_attn_kernel, negative_slope=0.2)
    return pl.pallas_call(
        kernel,
        out_shape=jax.ShapeDtypeStruct((Hh, N, C), xp.dtype),
        grid_spec=pltpu.PrefetchScalarGridSpec(
            num_scalar_prefetch=0,
            grid=(Gh,),
            in_specs=[
                pl.BlockSpec((hb, N, C), lambda h: (h, 0, 0)),
                pl.BlockSpec((hb, 1, C), lambda h: (h, 0, 0)),
                pl.BlockSpec((hb, 1, C), lambda h: (h, 0, 0)),
                pl.BlockSpec((N, N), lambda h: (0, 0)),
                pl.BlockSpec((hb, 1, C), lambda h: (h, 0, 0)),
            ],
            out_specs=pl.BlockSpec((hb, N, C), lambda h: (h, 0, 0)),
        ),
        compiler_params=pltpu.CompilerParams(
            dimension_semantics=("parallel",)),
    )(xp, att_src, att_dst, adj, bias)


# ----------------------------------------------------------------------------
# Pallas kernel 4: fused MLP head (Linear -> ReLU -> Linear), output padded to
# 128 lanes so the final store is lane-dense; sliced back to 2 outside.
# ----------------------------------------------------------------------------
def _mlp_kernel(x_ref, w1_ref, b1_ref, w2_ref, b2_ref, o_ref):
    h = jnp.dot(x_ref[...], w1_ref[...],
                preferred_element_type=jnp.float32) + b1_ref[...]
    h = jnp.maximum(h, 0.0)
    o_ref[...] = (jnp.dot(h, w2_ref[...], preferred_element_type=jnp.float32)
                  + b2_ref[...]).astype(o_ref.dtype)


def mlp_head(x, w1_t, b1, w2p_t, b2p):
    M = x.shape[0]
    Npad = w2p_t.shape[1]
    return pl.pallas_call(
        _mlp_kernel,
        out_shape=jax.ShapeDtypeStruct((M, Npad), jnp.float32),
    )(x, w1_t, b1.reshape(1, -1), w2p_t, b2p.reshape(1, -1))


# ----------------------------------------------------------------------------
# Parameters (deterministic synthetic init; shapes follow the PyTorch module)
# ----------------------------------------------------------------------------
def init_params(key):
    ks = jax.random.split(key, 16)

    def w(k, shape, scale=0.02):
        return scale * jax.random.normal(k, shape, dtype=jnp.float32)

    # avg_pool1d(kernel=3, stride=3) over the last dim is a fixed (768, 256)
    # matmul; fold it into lin_2 so the whole used Numerical_reason path is
    # exactly ONE linear: statement @ (pool @ w2).
    w2_t = w(ks[1], (D // 3, D))                      # Linear(256,768,bias=False).T
    pool = np.zeros((D, D // 3), np.float32)
    for j in range(D // 3):
        pool[3 * j: 3 * j + 3, j] = 1.0 / 3.0
    pool_w2_t = jnp.asarray(pool) @ w2_t              # (768, 768)

    wk_t = w(ks[4], (D, D)); bk = w(ks[5], (D,))
    wv_t = w(ks[6], (D, D)); bv = w(ks[7], (D,))

    mlp_w2_t = w(ks[13], (128, 2))
    mlp_b2 = jnp.zeros((2,), jnp.float32)
    mlp_w2p_t = jnp.zeros((128, 128), jnp.float32).at[:, :2].set(mlp_w2_t)
    mlp_b2p = jnp.zeros((128,), jnp.float32).at[:2].set(mlp_b2)

    params = {
        # Numerical_reason_layer.  lin_1 outputs (re_support / re_statement)
        # are dead in TDGAN.forward; the weight is kept but never applied.
        'w1_t': w(ks[0], (D, D)),
        'pool_w2_t': pool_w2_t,
        # MultiheadAttention(768, 4 heads); K and V projections fused.
        'wq_t': w(ks[2], (D, D)), 'bq': w(ks[3], (D,)),
        'wkv_t': jnp.concatenate([wk_t, wv_t], axis=1),          # (768, 1536)
        'bkv': jnp.concatenate([bk, bv]),
        'wo_t': w(ks[8], (D, D)), 'bo': jnp.zeros((D,), jnp.float32),
        # GATConv(16*768, 768, heads=4, concat=True): weight stored in bf16
        # (its matmul is purely HBM-bandwidth bound); f32 accumulation on MXU.
        'gat_w_t': w(ks[9], (QTOK * D, H * D), scale=0.01).astype(jnp.bfloat16),
        'att_src': w(ks[10], (H, D)),
        'att_dst': w(ks[11], (H, D)),
        'gat_bias': jnp.zeros((H * D,), jnp.float32),
        # Prediction_layer MLP(768 -> 128 -> 2), second layer padded to 128.
        'mlp_w1_t': w(ks[12], (D, 128)), 'mlp_b1': jnp.zeros((128,), jnp.float32),
        'mlp_w2p_t': mlp_w2p_t, 'mlp_b2p': mlp_b2p,
    }
    return params


# ----------------------------------------------------------------------------
# Forward pass glue (reshapes / head splitting / ragged batch handling)
# ----------------------------------------------------------------------------
def expand_to_node_batch(node_batch, c):
    batch = np.asarray(node_batch).tolist()
    # Ordered unique (node_batch is contiguous per graph): deterministic,
    # unlike the original's set() iteration order.
    graph_ids = list(dict.fromkeys(batch))
    batch_len = [batch.count(g) for g in graph_ids]
    parts = [jnp.broadcast_to(c[i][None], (n,) + tuple(c[i].shape))
             for i, n in enumerate(batch_len)]
    m = jnp.concatenate(parts, axis=0)
    return m, len(batch_len), batch_len


def tdgan_forward(params, support, statement, x_nodes, edge_index, node_batch):
    # ---------------- Numerical_reason_layer ----------------
    # re_support / re_statement are unused by TDGAN.forward -> dead compute
    # removed.  avg_pool1d(k=3) + lin_2 are fused into a single matmul.
    B, S, _ = statement.shape
    stm2 = statement.reshape(-1, D)
    c = linear(stm2, params['pool_w2_t']).reshape(B, S, D)

    # ---------------- GATNet ----------------
    m, batch_size, batch_list = expand_to_node_batch(node_batch, c)
    m = jnp.transpose(m, (1, 0, 2))                           # (S, Nn, D)
    Nn = m.shape[1]
    x = x_nodes.reshape(Nn, -1, D)                            # (Nn, 16, D)
    x = jnp.transpose(x, (1, 0, 2))                           # (16, Nn, D)
    Lq, Lk = x.shape[0], m.shape[0]
    Dh = D // H

    # nn.MultiheadAttention(768, 4): Q projection, fused K/V projection,
    # fused SDPA kernel batched over all (node, head) pairs, out-projection.
    q = linear(x.reshape(-1, D), params['wq_t'], params['bq'])
    kv = linear(m.reshape(-1, D), params['wkv_t'], params['bkv'])
    k, v = kv[:, :D], kv[:, D:]
    q = q.reshape(Lq, Nn, H, Dh).transpose(1, 2, 0, 3).reshape(Nn * H, Lq, Dh)
    k = k.reshape(Lk, Nn, H, Dh).transpose(1, 2, 0, 3).reshape(Nn * H, Lk, Dh)
    v = v.reshape(Lk, Nn, H, Dh).transpose(1, 2, 0, 3).reshape(Nn * H, Lk, Dh)
    attn_out = mha_attention(q, k, v)                         # (Nn*H, Lq, Dh)
    attn_out = attn_out.reshape(Nn, H, Lq, Dh).transpose(2, 0, 1, 3).reshape(Lq * Nn, D)
    # TODO(synk): averaged attention-weight output of MultiheadAttention is
    # unused downstream and is not computed.
    att_x = linear(attn_out, params['wo_t'], params['bo']).reshape(Lq, Nn, D)
    att_x = jnp.transpose(att_x, (1, 0, 2)).reshape(Nn, Lq * D)   # (Nn, 16*768)

    # GATConv(16*768, 768, heads=4): bf16 weight streamed in ~4 MiB tiles,
    # then per-head masked attention (all heads in a 2-step parallel grid).
    xp = linear(att_x, params['gat_w_t'])                     # (Nn, H*D) f32
    xp = xp.reshape(Nn, H, D).transpose(1, 0, 2)              # (H, Nn, D)
    adj = np.zeros((Nn, Nn), np.float32)                      # adj[dst, src]
    src = np.asarray(edge_index[0]); dst = np.asarray(edge_index[1])
    adj[dst, src] = 1.0
    adj[np.arange(Nn), np.arange(Nn)] = 1.0                   # add_self_loops
    gat_out = gat_attention(xp,
                            params['att_src'][:, None, :],
                            params['att_dst'][:, None, :],
                            jnp.asarray(adj),
                            params['gat_bias'].reshape(H, 1, D))   # (H, Nn, D)
    graph_out = jnp.transpose(gat_out, (1, 0, 2)).reshape(Nn, H * D)   # (Nn, 3072)

    # ---------------- Prediction_layer ----------------
    xr = graph_out.reshape(-1, batch_size, D).transpose(1, 0, 2)   # (batch, M, 768)
    Bp, Mrows, _ = xr.shape
    logits = mlp_head(xr.reshape(-1, D), params['mlp_w1_t'], params['mlp_b1'],
                      params['mlp_w2p_t'], params['mlp_b2p'])[:, :2]
    x0 = logits.reshape(Bp, Mrows, 2)

    # Ragged per-batch max pooling (Python-level list slicing in the original).
    bl = list(batch_list)
    bl.insert(0, 0)
    rows = []
    for i in range(batch_size):
        seg = x0[i, bl[i]: bl[i] + bl[i + 1], :]
        rows.append(jnp.max(seg, axis=0))
    x1 = jnp.stack(rows)                                       # (batch, 2)
    x1_probs = jnp.argmax(jax.nn.softmax(x1, axis=-1), axis=-1)
    return x1, x1_probs


# ----------------------------------------------------------------------------
if __name__ == "__main__":
    key = jax.random.PRNGKey(0)
    kp, k1, k2, k3 = jax.random.split(key, 4)
    params = init_params(kp)

    batch_size = 2
    S_stmt = 8
    support = jax.random.normal(k1, (batch_size, S_stmt, D), dtype=jnp.float32)
    statement = jax.random.normal(k2, (batch_size, S_stmt, D), dtype=jnp.float32)

    node_batch = np.array([0, 0, 1, 1], dtype=np.int32)        # 2 graphs, 2 nodes each
    Nn = int(node_batch.shape[0])
    x_nodes = jax.random.normal(k3, (Nn, QTOK * D), dtype=jnp.float32)
    edge_index = np.array([[0, 1, 1, 2, 2, 3],
                           [1, 0, 2, 1, 3, 2]], dtype=np.int32)

    out, out_probs = tdgan_forward(params, support, statement, x_nodes,
                                   edge_index, node_batch)
    jax.block_until_ready((out, out_probs))
    assert out.shape == (batch_size, 2) and out_probs.shape == (batch_size,)
    print("KERNEL_OK")
</pallas_src>

<mosaic_0001>
module attributes {stable_mosaic.version = 11 : i64} {
  func.func @_matmul_kernel(%arg0: i32, %arg1: i32, %arg2: memref<16x768xf32, #tpu.memory_space<vmem>>, %arg3: memref<768x768xf32, #tpu.memory_space<vmem>>, %arg4: memref<1x768xf32, #tpu.memory_space<vmem>>, %arg5: memref<16x768xf32, #tpu.memory_space<vmem>>) attributes {dimension_semantics = [#tpu.dimension_semantics<parallel>, #tpu.dimension_semantics<arbitrary>], iteration_bounds = array<i64: 1, 1>, scalar_prefetch = 0 : i64, scratch_operands = 0 : i64, tpu.core_type = #tpu.core_type<tc>, window_params = [{transform_indices = @transform_0, window_bounds = array<i64: 16, 768>}, {transform_indices = @transform_1, window_bounds = array<i64: 768, 768>}, {transform_indices = @transform_2, window_bounds = array<i64: 1, 768>}, {transform_indices = @transform_3, window_bounds = array<i64: 16, 768>}]} {
    %c0 = arith.constant 0 : index
    %c0_0 = arith.constant 0 : index
    %0 = vector.load %arg2[%c0, %c0_0] : memref<16x768xf32, #tpu.memory_space<vmem>>, vector<16x768xf32>
    %c0_1 = arith.constant 0 : index
    %c0_2 = arith.constant 0 : index
    %1 = vector.load %arg3[%c0_1, %c0_2] : memref<768x768xf32, #tpu.memory_space<vmem>>, vector<768x768xf32>
    %cst = arith.constant dense<0.000000e+00> : vector<16x768xf32>
    %2 = tpu.matmul %0, %1, %cst {dimension_numbers = #tpu.dot_dimension_numbers<[1], [0], [0], [1], [0, 0, 1, 1], [], []>} : vector<16x768xf32>, vector<768x768xf32>, vector<16x768xf32> -> vector<16x768xf32>
    %c0_3 = arith.constant 0 : index
    %c0_4 = arith.constant 0 : index
    %3 = vector.load %arg4[%c0_3, %c0_4] : memref<1x768xf32, #tpu.memory_space<vmem>>, vector<1x768xf32>
    %4 = vector.broadcast %3 : vector<1x768xf32> to vector<16x768xf32>
    %5 = arith.addf %2, %4 : vector<16x768xf32>
    %c0_5 = arith.constant 0 : index
    %c0_6 = arith.constant 0 : index
    %6 = vector.load %arg5[%c0_5, %c0_6] : memref<16x768xf32, #tpu.memory_space<vmem>>, vector<16x768xf32>
    tpu.vector_store %arg5[%c0_5, %c0_6], %5 {strides = array<i32>} : memref<16x768xf32, #tpu.memory_space<vmem>>, vector<16x768xf32>,
    return
  }
  func.func @transform_0(%arg0: i32, %arg1: i32) -> (i32, i32) {
    %c0_i32 = arith.constant 0 : i32
    %c0_i32_0 = arith.constant 0 : i32
    return %c0_i32, %arg1 : i32, i32
  }
  func.func @transform_1(%arg0: i32, %arg1: i32) -> (i32, i32) {
    %c0_i32 = arith.constant 0 : i32
    return %arg1, %arg0 : i32, i32
  }
  func.func @transform_2(%arg0: i32, %arg1: i32) -> (i32, i32) {
    %c0_i32 = arith.constant 0 : i32
    %c0_i32_0 = arith.constant 0 : i32
    return %c0_i32, %arg0 : i32, i32
  }
  func.func @transform_3(%arg0: i32, %arg1: i32) -> (i32, i32) {
    %c0_i32 = arith.constant 0 : i32
    %c0_i32_0 = arith.constant 0 : i32
    return %c0_i32, %arg0 : i32, i32
  }
}

</mosaic_0001>

<bundles_post_ra>
// kernel: tpu_custom_call.1
= control target key start
LH: loop header
LB: loop body
LE: loop exit
PB: predicated region body
PF: predicated region fallthrough
CT: control target
= control target key end

     0   :  { %8 = vsyncpa [#allocation3], 0  ;;  %s2296_s0 = inlined_call_operand.hbm [shape: f32[16,768], index: 0, kind: input, shape index: {}]   ;;  %s2297_s1 = inlined_call_operand.hbm [shape: f32[768,768], index: 1, kind: input, shape index: {}]   ;;  %s2298_s2 = inlined_call_operand.hbm [shape: f32[1,768], index: 2, kind: input, shape index: {}]   ;;  %s2299_s3 = inlined_call_operand.hbm [shape: f32[16,768], index: 3, kind: output, shape index: {}]  }
   0x1   :  { %9 = vsyncpa [#allocation6], 0 }
   0x2   :  { %10 = vsyncpa [#allocation4], 0  ;;  %s2150_s12 = smov [#allocation5]   ;;  %s2151_s14 = smov [#allocation2]  }
   0x3   :  { %s28_s13 = sshll.u32 %s2150_s12, 4  ;;  %s16_s15 = sshll.u32 %s2151_s14, 4  ;;  %s29_s13 = int_to_ptr.vmem [resolvable:$true] %s28_s13  ;;  %s2176_s15 = int_to_ptr.vmem [resolvable:$true] %s16_s15 }
   0x4   :  { %s2056_s18 = scalar_lea.hbm %s2297_s1, 73728 }
   0x5   :  { %p2057_p0 = scmp.ne.s32.totalorder %s2297_s1, %s2056_s18  ;;  %p2060_p1 = scmp.lt.u32.totalorder %s2056_s18, %s2297_s1 }
   0x7   :  { %p2062_p2 = pnand %p2060_p1, %p2057_p0 }
   0x9   :  { %2065 = shalt.err (!%p2062_p2)
}
   0xa   :  { %s2066_s23 = scalar_lea.vmem %s29_s13, 73728  ;;  %p2071_p4 = scmp.lt.s32.totalorder %s29_s13, %s29_s13 }
   0xb   :  { %p2067_p3 = scmp.ne.s32.totalorder %s29_s13, %s2066_s23  ;;  %p2072_p5 = scmp.lt.s32.totalorder %s2066_s23, %s2066_s23 }
   0xd   :  { %p2073_p6 = por %p2072_p5, %p2071_p4 }
   0xf   :  { %p2074_p7 = pnand %p2073_p6, %p2067_p3 }
  0x11   :  { %2077 = shalt.err (!%p2074_p7)
}
  0x12   :  { %s2152_s24 = smov 768   ;;  %s2153_s25 = smov 48  }
  0x13   :  { %34 = dma.hbm_to_vmem [thread:$0]  %s2297_s1, 73728, %s29_s13, [#allocation6], %s2152_s24, %s2152_s24, %s2153_s25  }
  0x14   :  { %s2078_s30 = scalar_lea.hbm %s2296_s0, 1536 }
  0x15   :  { %p2079_p8 = scmp.ne.s32.totalorder %s2296_s0, %s2078_s30  ;;  %p2082_p9 = scmp.lt.u32.totalorder %s2078_s30, %s2296_s0 }
  0x17   :  { %p2084_p10 = pnand %p2082_p9, %p2079_p8 }
  0x19   :  { %2087 = shalt.err (!%p2084_p10)
}
  0x1a   :  { %s2088_s8 = scalar_lea.vmem %s2176_s15, 1536  ;;  %p2093_p12 = scmp.lt.s32.totalorder %s2176_s15, %s2176_s15 }
  0x1b   :  { %p2089_p11 = scmp.ne.s32.totalorder %s2176_s15, %s2088_s8  ;;  %p2094_p13 = scmp.lt.s32.totalorder %s2088_s8, %s2088_s8 }
  0x1d   :  { %p2095_p0 = por %p2094_p13, %p2093_p12 }
  0x1f   :  { %p2096_p1 = pnand %p2095_p0, %p2089_p11 }
  0x21   :  { %2099 = shalt.err (!%p2096_p1)
}
  0x22   :  { %22 = dma.hbm_to_vmem [thread:$0]  %s2296_s0, 1536, %s2176_s15, [#allocation3], %s2152_s24, %s2152_s24, %s2153_s25  }
  0x23   :  { %s2154_s10 = smov [#allocation7]   ;;  %s2100_s14 = scalar_lea.hbm %s2298_s2, 96 }
  0x24   :  { %s41_s11 = sshll.u32 %s2154_s10, 4  ;;  %p2101_p2 = scmp.ne.s32.totalorder %s2298_s2, %s2100_s14  ;;  %s42_s11 = int_to_ptr.vmem [resolvable:$true] %s41_s11 }
  0x25   :  { %p2104_p3 = scmp.lt.u32.totalorder %s2100_s14, %s2298_s2 }
  0x27   :  { %p2106_p4 = pnand %p2104_p3, %p2101_p2 }
  0x29   :  { %2109 = shalt.err (!%p2106_p4)
}
  0x2a   :  { %s2110_s20 = scalar_lea.vmem %s42_s11, 96  ;;  %p2115_p6 = scmp.lt.s32.totalorder %s42_s11, %s42_s11 }
  0x2b   :  { %p2111_p5 = scmp.ne.s32.totalorder %s42_s11, %s2110_s20  ;;  %p2116_p7 = scmp.lt.s32.totalorder %s2110_s20, %s2110_s20 }
  0x2d   :  { %p2117_p8 = por %p2116_p7, %p2115_p6 }
  0x2f   :  { %p2118_p9 = pnand %p2117_p8, %p2111_p5 }
  0x31   :  { %2121 = shalt.err (!%p2118_p9)
}
  0x32   :  { %44 = dma.hbm_to_vmem [thread:$0]  %s2298_s2, 96, %s42_s11, [#allocation6]  }
  0x33   :  { %2144 = dma.done.wait [#allocation3], 1536  }
  0x34   :  { %2145 = vsyncadd [#allocation3], 4294965760 }
  0x35   :  { %2146 = dma.done.wait [#allocation6], 73824  }
  0x36   :  { %2147 = vsyncadd [#allocation6], 4294893472  ;;  %v67_v0 = vld [vmem:[#allocation5 + $0x8] sm:$0xff]  ;;  %v73_v1 = vld [vmem:[#allocation5 + $0x38] sm:$0xff]  ;;  %s2155_s2 = smov [#allocation8]  }
  0x37   :  { %v259_v2 = vld [vmem:[#allocation5 + $0x608] sm:$0xff]  ;;  %v1397_v3 = vpack.c.bf16 %v73_v1, %v67_v0  ;;  %v265_v4 = vld [vmem:[#allocation5 + $0x638] sm:$0xff]  ;;  %v66_v5 = vld [vmem:[#allocation5] sm:$0xff]  ;;  %s1384_s21 = sshll.u32 %s2155_s2, 4  ;;  %s1385_s21 = int_to_ptr.vmem [resolvable:$true] %s1384_s21 }
  0x38   :  { %v72_v6 = vld [vmem:[#allocation5 + $0x30] sm:$0xff]  ;;  %v1461_v7 = vpack.c.bf16 %v265_v4, %v259_v2  ;;  %v258_v9 = vld [vmem:[#allocation5 + $0x600] sm:$0xff]  ;;  %v79_v11 = vld [vmem:[#allocation5 + $0x68] sm:$0xff]  ;;  %s2122_s22 = scalar_lea.vmem %s1385_s21, 1536  ;;  %p2127_p11 = scmp.lt.s32.totalorder %s1385_s21, %s1385_s21 }
  0x39   :  { %v1399_v8 = vpack.c.bf16 %v72_v6, %v66_v5  ;;  %v264_v10 = vld [vmem:[#allocation5 + $0x630] sm:$0xff]  ;;  %1398 = vmatprep.subr.bf16.mxu1 %v1397_v3  ;;  %v85_v13 = vld [vmem:[#allocation5 + $0x98] sm:$0xff]  ;;  %v271_v14 = vld [vmem:[#allocation5 + $0x668] sm:$0xff]  ;;  %p2123_p10 = scmp.ne.s32.totalorder %s1385_s21, %s2122_s22  ;;  %p2128_p12 = scmp.lt.s32.totalorder %s2122_s22, %s2122_s22 }
  0x3a   :  { %v1463_v12 = vpack.c.bf16 %v264_v10, %v258_v9  ;;  %v277_v15 = vld [vmem:[#allocation5 + $0x698] sm:$0xff]  ;;  %1462 = vmatprep.subr.bf16.mxu0 %v1461_v7  ;;  %v1401_v16 = vpack.c.bf16 %v85_v13, %v79_v11  ;;  %v78_v18 = vld [vmem:[#allocation5 + $0x60] sm:$0xff]  ;;  %v84_v19 = vld [vmem:[#allocation5 + $0x90] sm:$0xff] }
  0x3b   :  { %1400 = vmatpush1.bf16.msra.mxu1 %v1399_v8  ;;  %v1465_v17 = vpack.c.bf16 %v277_v15, %v271_v14  ;;  %v270_v20 = vld [vmem:[#allocation5 + $0x660] sm:$0xff]  ;;  %v1403_v21 = vpack.c.bf16 %v84_v19, %v78_v18  ;;  %v276_v22 = vld [vmem:[#allocation5 + $0x690] sm:$0xff]  ;;  %v91_v23 = vld [vmem:[#allocation5 + $0xc8] sm:$0xff]  ;;  %p2129_p13 = por %p2128_p12, %p2127_p11 }
  0x3c   :  { %1464 = vmatpush1.bf16.msra.mxu0 %v1463_v12  ;;  %v97_v24 = vld [vmem:[#allocation5 + $0xf8] sm:$0xff]  ;;  %1402 = vmatprep.subr.bf16.mxu1 %v1401_v16  ;;  %v1467_v25 = vpack.c.bf16 %v276_v22, %v270_v20  ;;  %v283_v27 = vld [vmem:[#allocation5 + $0x6c8] sm:$0xff]  ;;  %v90_v29 = vld [vmem:[#allocation5 + $0xc0] sm:$0xff] }
  0x3d   :  { %1466 = vmatprep.subr.bf16.mxu0 %v1465_v17  ;;  %v1405_v26 = vpack.c.bf16 %v97_v24, %v91_v23  ;;  %v289_v28 = vld [vmem:[#allocation5 + $0x6f8] sm:$0xff]  ;;  %v96_v31 = vld [vmem:[#allocation5 + $0xf0] sm:$0xff]  ;;  %v282_v32 = vld [vmem:[#allocation5 + $0x6c0] sm:$0xff]  ;;  %p2130_p0 = pnand %p2129_p13, %p2123_p10 }
  0x3e   :  { %v1469_v30 = vpack.c.bf16 %v289_v28, %v283_v27  ;;  %v288_v33 = vld [vmem:[#allocation5 + $0x6f0] sm:$0xff]  ;;  %v1407_v34 = vpack.c.bf16 %v96_v31, %v90_v29  ;;  %v103_v35 = vld [vmem:[#allocation5 + $0x128] sm:$0xff]  ;;  %v109_v36 = vld [vmem:[#allocation5 + $0x158] sm:$0xff] }
  0x3f   :  { %1404 = vmatpush1.bf16.msra.mxu1 %v1403_v21  ;;  %v295_v37 = vld [vmem:[#allocation5 + $0x728] sm:$0xff]  ;;  %v1471_v38 = vpack.c.bf16 %v288_v33, %v282_v32  ;;  %v1409_v39 = vpack.c.bf16 %v109_v36, %v103_v35  ;;  %v301_v40 = vld [vmem:[#allocation5 + $0x758] sm:$0xff]  ;;  %v102_v41 = vld [vmem:[#allocation5 + $0x120] sm:$0xff] }
  0x40   :  { %1468 = vmatpush1.bf16.msra.mxu0 %v1467_v25  ;;  %1406 = vmatprep.subr.bf16.mxu1 %v1405_v26  ;;  %v108_v42 = vld [vmem:[#allocation5 + $0x150] sm:$0xff]  ;;  %v1473_v43 = vpack.c.bf16 %v301_v40, %v295_v37  ;;  %v294_v44 = vld [vmem:[#allocation5 + $0x720] sm:$0xff]  ;;  %v115_v46 = vld [vmem:[#allocation5 + $0x188] sm:$0xff] }
  0x41   :  { %1470 = vmatprep.subr.bf16.mxu0 %v1469_v30  ;;  %v300_v45 = vld [vmem:[#allocation5 + $0x750] sm:$0xff]  ;;  %v121_v47 = vld [vmem:[#allocation5 + $0x1b8] sm:$0xff]  ;;  %v307_v48 = vld [vmem:[#allocation5 + $0x788] sm:$0xff]  ;;  %v1411_v50 = vpack.c.bf16 %v108_v42, %v102_v41 }
  0x42   :  { %v313_v49 = vld [vmem:[#allocation5 + $0x7b8] sm:$0xff]  ;;  %v1475_v51 = vpack.c.bf16 %v300_v45, %v294_v44  ;;  %v1413_v52 = vpack.c.bf16 %v121_v47, %v115_v46  ;;  %v114_v53 = vld [vmem:[#allocation5 + $0x180] sm:$0xff]  ;;  %v120_v54 = vld [vmem:[#allocation5 + $0x1b0] sm:$0xff] }
  0x43   :  { %1408 = vmatpush1.bf16.msra.mxu1 %v1407_v34  ;;  %v306_v55 = vld [vmem:[#allocation5 + $0x780] sm:$0xff]  ;;  %v1477_v56 = vpack.c.bf16 %v313_v49, %v307_v48  ;;  %v312_v57 = vld [vmem:[#allocation5 + $0x7b0] sm:$0xff]  ;;  %v127_v58 = vld [vmem:[#allocation5 + $0x1e8] sm:$0xff]  ;;  %v1415_v62 = vpack.c.bf16 %v120_v54, %v114_v53 }
  0x44   :  { %1472 = vmatpush1.bf16.msra.mxu0 %v1471_v38  ;;  %1410 = vmatprep.subr.bf16.mxu1 %v1409_v39  ;;  %v133_v59 = vld [vmem:[#allocation5 + $0x218] sm:$0xff]  ;;  %v319_v60 = vld [vmem:[#allocation5 + $0x7e8] sm:$0xff]  ;;  %v1479_v63 = vpack.c.bf16 %v312_v57, %v306_v55  ;;  %v126_v1 = vld [vmem:[#allocation5 + $0x1e0] sm:$0xff] }
  0x45   :  { %1474 = vmatprep.subr.bf16.mxu0 %v1473_v43  ;;  %v325_v61 = vld [vmem:[#allocation5 + $0x818] sm:$0xff]  ;;  %v1417_v0 = vpack.c.bf16 %v133_v59, %v127_v58  ;;  %v132_v2 = vld [vmem:[#allocation5 + $0x210] sm:$0xff]  ;;  %v318_v3 = vld [vmem:[#allocation5 + $0x7e0] sm:$0xff] }
  0x46   :  { %v1481_v4 = vpack.c.bf16 %v325_v61, %v319_v60  ;;  %v324_v5 = vld [vmem:[#allocation5 + $0x810] sm:$0xff]  ;;  %v139_v6 = vld [vmem:[#allocation5 + $0x248] sm:$0xff]  ;;  %v145_v7 = vld [vmem:[#allocation5 + $0x278] sm:$0xff]  ;;  %v1419_v10 = vpack.c.bf16 %v132_v2, %v126_v1 }
  0x47   :  { %1412 = vmatpush1.bf16.msra.mxu1 %v1411_v50  ;;  %v331_v8 = vld [vmem:[#allocation5 + $0x848] sm:$0xff]  ;;  %v337_v9 = vld [vmem:[#allocation5 + $0x878] sm:$0xff]  ;;  %v1483_v11 = vpack.c.bf16 %v324_v5, %v318_v3  ;;  %v1421_v12 = vpack.c.bf16 %v145_v7, %v139_v6  ;;  %v138_v13 = vld [vmem:[#allocation5 + $0x240] sm:$0xff] }
  0x48   :  { %1476 = vmatpush1.bf16.msra.mxu0 %v1475_v51  ;;  %1414 = vmatprep.subr.bf16.mxu1 %v1413_v52  ;;  %v144_v14 = vld [vmem:[#allocation5 + $0x270] sm:$0xff]  ;;  %v330_v15 = vld [vmem:[#allocation5 + $0x840] sm:$0xff]  ;;  %v1485_v16 = vpack.c.bf16 %v337_v9, %v331_v8  ;;  %v151_v18 = vld [vmem:[#allocation5 + $0x2a8] sm:$0xff] }
  0x49   :  { %1478 = vmatprep.subr.bf16.mxu0 %v1477_v56  ;;  %v336_v17 = vld [vmem:[#allocation5 + $0x870] sm:$0xff]  ;;  %v157_v19 = vld [vmem:[#allocation5 + $0x2d8] sm:$0xff]  ;;  %v343_v20 = vld [vmem:[#allocation5 + $0x8a8] sm:$0xff]  ;;  %v1423_v22 = vpack.c.bf16 %v144_v14, %v138_v13 }
  0x4a   :  { %v349_v21 = vld [vmem:[#allocation5 + $0x8d8] sm:$0xff]  ;;  %v1487_v23 = vpack.c.bf16 %v336_v17, %v330_v15  ;;  %v1425_v24 = vpack.c.bf16 %v157_v19, %v151_v18  ;;  %v150_v25 = vld [vmem:[#allocation5 + $0x2a0] sm:$0xff]  ;;  %v156_v26 = vld [vmem:[#allocation5 + $0x2d0] sm:$0xff] }
  0x4b   :  { %1416 = vmatpush1.bf16.msra.mxu1 %v1415_v62  ;;  %v342_v27 = vld [vmem:[#allocation5 + $0x8a0] sm:$0xff]  ;;  %v1489_v28 = vpack.c.bf16 %v349_v21, %v343_v20  ;;  %v348_v29 = vld [vmem:[#allocation5 + $0x8d0] sm:$0xff]  ;;  %v163_v30 = vld [vmem:[#allocation5 + $0x308] sm:$0xff]  ;;  %v1427_v34 = vpack.c.bf16 %v156_v26, %v150_v25 }
  0x4c   :  { %1480 = vmatpush1.bf16.msra.mxu0 %v1479_v63  ;;  %1418 = vmatprep.subr.bf16.mxu1 %v1417_v0  ;;  %v169_v31 = vld [vmem:[#allocation5 + $0x338] sm:$0xff]  ;;  %v355_v32 = vld [vmem:[#allocation5 + $0x908] sm:$0xff]  ;;  %v1491_v35 = vpack.c.bf16 %v348_v29, %v342_v27  ;;  %v162_v37 = vld [vmem:[#allocation5 + $0x300] sm:$0xff] }
  0x4d   :  { %1482 = vmatprep.subr.bf16.mxu0 %v1481_v4  ;;  %v361_v33 = vld [vmem:[#allocation5 + $0x938] sm:$0xff]  ;;  %v1429_v36 = vpack.c.bf16 %v169_v31, %v163_v30  ;;  %v168_v38 = vld [vmem:[#allocation5 + $0x330] sm:$0xff]  ;;  %v354_v39 = vld [vmem:[#allocation5 + $0x900] sm:$0xff] }
  0x4e   :  { %v1493_v40 = vpack.c.bf16 %v361_v33, %v355_v32  ;;  %v360_v41 = vld [vmem:[#allocation5 + $0x930] sm:$0xff]  ;;  %v175_v42 = vld [vmem:[#allocation5 + $0x368] sm:$0xff]  ;;  %v181_v43 = vld [vmem:[#allocation5 + $0x398] sm:$0xff]  ;;  %v1431_v46 = vpack.c.bf16 %v168_v38, %v162_v37 }
  0x4f   :  { %1420 = vmatpush1.bf16.msra.mxu1 %v1419_v10  ;;  %v367_v44 = vld [vmem:[#allocation5 + $0x968] sm:$0xff]  ;;  %v373_v45 = vld [vmem:[#allocation5 + $0x998] sm:$0xff]  ;;  %v1495_v47 = vpack.c.bf16 %v360_v41, %v354_v39  ;;  %v1433_v48 = vpack.c.bf16 %v181_v43, %v175_v42  ;;  %v174_v49 = vld [vmem:[#allocation5 + $0x360] sm:$0xff] }
  0x50   :  { %1484 = vmatpush1.bf16.msra.mxu0 %v1483_v11  ;;  %1422 = vmatprep.subr.bf16.mxu1 %v1421_v12  ;;  %v180_v50 = vld [vmem:[#allocation5 + $0x390] sm:$0xff]  ;;  %v366_v51 = vld [vmem:[#allocation5 + $0x960] sm:$0xff]  ;;  %v1497_v52 = vpack.c.bf16 %v373_v45, %v367_v44  ;;  %v187_v54 = vld [vmem:[#allocation5 + $0x3c8] sm:$0xff] }
  0x51   :  { %1486 = vmatprep.subr.bf16.mxu0 %v1485_v16  ;;  %v372_v53 = vld [vmem:[#allocation5 + $0x990] sm:$0xff]  ;;  %v193_v55 = vld [vmem:[#allocation5 + $0x3f8] sm:$0xff]  ;;  %v379_v56 = vld [vmem:[#allocation5 + $0x9c8] sm:$0xff]  ;;  %v1435_v58 = vpack.c.bf16 %v180_v50, %v174_v49 }
  0x52   :  { %v385_v57 = vld [vmem:[#allocation5 + $0x9f8] sm:$0xff]  ;;  %v1499_v59 = vpack.c.bf16 %v372_v53, %v366_v51  ;;  %v1437_v60 = vpack.c.bf16 %v193_v55, %v187_v54  ;;  %v186_v61 = vld [vmem:[#allocation5 + $0x3c0] sm:$0xff]  ;;  %v192_v62 = vld [vmem:[#allocation5 + $0x3f0] sm:$0xff] }
  0x53   :  { %1424 = vmatpush1.bf16.msra.mxu1 %v1423_v22  ;;  %v378_v63 = vld [vmem:[#allocation5 + $0x9c0] sm:$0xff]  ;;  %v1501_v0 = vpack.c.bf16 %v385_v57, %v379_v56  ;;  %v384_v1 = vld [vmem:[#allocation5 + $0x9f0] sm:$0xff]  ;;  %v199_v2 = vld [vmem:[#allocation5 + $0x428] sm:$0xff]  ;;  %v1439_v6 = vpack.c.bf16 %v192_v62, %v186_v61 }
  0x54   :  { %1488 = vmatpush1.bf16.msra.mxu0 %v1487_v23  ;;  %1426 = vmatprep.subr.bf16.mxu1 %v1425_v24  ;;  %v205_v3 = vld [vmem:[#allocation5 + $0x458] sm:$0xff]  ;;  %v391_v4 = vld [vmem:[#allocation5 + $0xa28] sm:$0xff]  ;;  %v198_v7 = vld [vmem:[#allocation5 + $0x420] sm:$0xff]  ;;  %v1503_v8 = vpack.c.bf16 %v384_v1, %v378_v63 }
  0x55   :  { %1490 = vmatprep.subr.bf16.mxu0 %v1489_v28  ;;  %v397_v5 = vld [vmem:[#allocation5 + $0xa58] sm:$0xff]  ;;  %v1441_v9 = vpack.c.bf16 %v205_v3, %v199_v2  ;;  %v204_v10 = vld [vmem:[#allocation5 + $0x450] sm:$0xff]  ;;  %v390_v11 = vld [vmem:[#allocation5 + $0xa20] sm:$0xff] }
  0x56   :  { %v396_v12 = vld [vmem:[#allocation5 + $0xa50] sm:$0xff]  ;;  %v1505_v13 = vpack.c.bf16 %v397_v5, %v391_v4  ;;  %v211_v14 = vld [vmem:[#allocation5 + $0x488] sm:$0xff]  ;;  %v217_v15 = vld [vmem:[#allocation5 + $0x4b8] sm:$0xff]  ;;  %v1443_v20 = vpack.c.bf16 %v204_v10, %v198_v7 }
  0x57   :  { %1428 = vmatpush1.bf16.msra.mxu1 %v1427_v34  ;;  %v2225_v16 = vld [vmem:[#allocation2 + $0x8] sm:$0xff]  ;;  %v409_v18 = vld [vmem:[#allocation5 + $0xab8] sm:$0xff]  ;;  %v1507_v21 = vpack.c.bf16 %v396_v12, %v390_v11  ;;  %v1445_v22 = vpack.c.bf16 %v217_v15, %v211_v14  ;;  %v210_v23 = vld [vmem:[#allocation5 + $0x480] sm:$0xff] }
  0x58   :  { %1492 = vmatpush1.bf16.msra.mxu0 %v1491_v35  ;;  %1430 = vmatprep.subr.bf16.mxu1 %v1429_v36  ;;  %v403_v17 = vld [vmem:[#allocation5 + $0xa88] sm:$0xff]  ;;  %v2228_v19 = vld [vmem:[#allocation2 + $0x18] sm:$0xff]  ;;  %v216_v24 = vld [vmem:[#allocation5 + $0x4b0] sm:$0xff] }
  0x59   :  { %1494 = vmatprep.subr.bf16.mxu0 %v1493_v40  ;;  %738 = vmatprep.mubr.f32.mxu1 %v2225_v16  ;;  %v402_v25 = vld [vmem:[#allocation5 + $0xa80] sm:$0xff]  ;;  %v1509_v26 = vpack.c.bf16 %v409_v18, %v403_v17  ;;  %v408_v27 = vld [vmem:[#allocation5 + $0xab0] sm:$0xff]  ;;  %v223_v28 = vld [vmem:[#allocation5 + $0x4e8] sm:$0xff]  ;;  %v1447_v32 = vpack.c.bf16 %v216_v24, %v210_v23 }
  0x5a   :  { %815 = vmatprep.mubr.f32.mxu0 %v2228_v19  ;;  %v229_v29 = vld [vmem:[#allocation5 + $0x518] sm:$0xff]  ;;  %v415_v30 = vld [vmem:[#allocation5 + $0xae8] sm:$0xff]  ;;  %v1511_v33 = vpack.c.bf16 %v408_v27, %v402_v25  ;;  %v222_v35 = vld [vmem:[#allocation5 + $0x4e0] sm:$0xff] }
  0x5b   :  { %1432 = vmatpush1.bf16.msra.mxu1 %v1431_v46  ;;  %v421_v31 = vld [vmem:[#allocation5 + $0xb18] sm:$0xff]  ;;  %v1449_v34 = vpack.c.bf16 %v229_v29, %v223_v28  ;;  %v228_v36 = vld [vmem:[#allocation5 + $0x510] sm:$0xff]  ;;  %v414_v37 = vld [vmem:[#allocation5 + $0xae0] sm:$0xff] }
  0x5c   :  { %1496 = vmatpush1.bf16.msra.mxu0 %v1495_v47  ;;  %1434 = vmatprep.subr.bf16.mxu1 %v1433_v48  ;;  %v1513_v38 = vpack.c.bf16 %v421_v31, %v415_v30  ;;  %v420_v39 = vld [vmem:[#allocation5 + $0xb10] sm:$0xff]  ;;  %v235_v40 = vld [vmem:[#allocation5 + $0x548] sm:$0xff]  ;;  %v241_v41 = vld [vmem:[#allocation5 + $0x578] sm:$0xff]  ;;  %v1451_v44 = vpack.c.bf16 %v228_v36, %v222_v35 }
  0x5d   :  { %1498 = vmatprep.subr.bf16.mxu0 %v1497_v52  ;;  %v427_v42 = vld [vmem:[#allocation5 + $0xb48] sm:$0xff]  ;;  %v433_v43 = vld [vmem:[#allocation5 + $0xb78] sm:$0xff]  ;;  %v1515_v45 = vpack.c.bf16 %v420_v39, %v414_v37  ;;  %v1453_v46 = vpack.c.bf16 %v241_v41, %v235_v40  ;;  %v234_v47 = vld [vmem:[#allocation5 + $0x540] sm:$0xff] }
  0x5e   :  { %v240_v48 = vld [vmem:[#allocation5 + $0x570] sm:$0xff]  ;;  %v426_v49 = vld [vmem:[#allocation5 + $0xb40] sm:$0xff]  ;;  %v1517_v50 = vpack.c.bf16 %v433_v43, %v427_v42  ;;  %v247_v52 = vld [vmem:[#allocation5 + $0x5a8] sm:$0xff] }
  0x5f   :  { %1436 = vmatpush1.bf16.msra.mxu1 %v1435_v58  ;;  %v432_v51 = vld [vmem:[#allocation5 + $0xb70] sm:$0xff]  ;;  %v253_v53 = vld [vmem:[#allocation5 + $0x5d8] sm:$0xff]  ;;  %v439_v54 = vld [vmem:[#allocation5 + $0xba8] sm:$0xff]  ;;  %v1455_v56 = vpack.c.bf16 %v240_v48, %v234_v47 }
  0x60   :  { %1500 = vmatpush1.bf16.msra.mxu0 %v1499_v59  ;;  %1438 = vmatprep.subr.bf16.mxu1 %v1437_v60  ;;  %v445_v55 = vld [vmem:[#allocation5 + $0xbd8] sm:$0xff]  ;;  %v1519_v57 = vpack.c.bf16 %v432_v51, %v426_v49  ;;  %v1457_v58 = vpack.c.bf16 %v253_v53, %v247_v52  ;;  %v246_v59 = vld [vmem:[#allocation5 + $0x5a0] sm:$0xff]  ;;  %v252_v60 = vld [vmem:[#allocation5 + $0x5d0] sm:$0xff] }
  0x61   :  { %1502 = vmatprep.subr.bf16.mxu0 %v1501_v0  ;;  %v438_v61 = vld [vmem:[#allocation5 + $0xba0] sm:$0xff]  ;;  %v1521_v62 = vpack.c.bf16 %v445_v55, %v439_v54  ;;  %v444_v63 = vld [vmem:[#allocation5 + $0xbd0] sm:$0xff]  ;;  %v69_v0 = vld [vmem:[#allocation5 + $0x18] sm:$0xff]  ;;  %v1459_v4 = vpack.c.bf16 %v252_v60, %v246_v59 }
  0x62   :  { %v75_v1 = vld [vmem:[#allocation5 + $0x48] sm:$0xff]  ;;  %v457_v3 = vld [vmem:[#allocation5 + $0xc38] sm:$0xff]  ;;  %v1523_v5 = vpack.c.bf16 %v444_v63, %v438_v61  ;;  %v450_v7 = vld [vmem:[#allocation5 + $0xc00] sm:$0xff] }
  0x63   :  { %1440 = vmatpush1.bf16.msra.mxu1 %v1439_v6  ;;  %v451_v2 = vld [vmem:[#allocation5 + $0xc08] sm:$0xff]  ;;  %v1589_v6 = vpack.c.bf16 %v75_v1, %v69_v0  ;;  %v456_v11 = vld [vmem:[#allocation5 + $0xc30] sm:$0xff]  ;;  %v81_v12 = vld [vmem:[#allocation5 + $0x78] sm:$0xff] }
  0x64   :  { %1504 = vmatpush1.bf16.msra.mxu0 %v1503_v8  ;;  %1442 = vmatprep.subr.bf16.mxu1 %v1441_v9  ;;  %v68_v8 = vld [vmem:[#allocation5 + $0x10] sm:$0xff]  ;;  %v74_v9 = vld [vmem:[#allocation5 + $0x40] sm:$0xff]  ;;  %v1525_v10 = vpack.c.bf16 %v457_v3, %v451_v2  ;;  %v463_v14 = vld [vmem:[#allocation5 + $0xc68] sm:$0xff] }
  0x65   :  { %1506 = vmatprep.subr.bf16.mxu0 %v1505_v13  ;;  %v87_v13 = vld [vmem:[#allocation5 + $0xa8] sm:$0xff]  ;;  %v469_v15 = vld [vmem:[#allocation5 + $0xc98] sm:$0xff]  ;;  %v2231_v17 = vld [vmem:[#allocation2] sm:$0xff] }
  0x66   :  { %v56_v18 = vld [vmem:[#allocation2 + $0x10] sm:$0xff]  ;;  %v462_v23 = vld [vmem:[#allocation5 + $0xc60] sm:$0xff]  ;;  %v93_v28 = vld [vmem:[#allocation5 + $0xd8] sm:$0xff] }
  0x67   :  { %1444 = vmatpush1.bf16.msra.mxu1 %v1443_v20  ;;  %v1591_v20 = vpack.c.bf16 %v74_v9, %v68_v8  ;;  %v80_v24 = vld [vmem:[#allocation5 + $0x70] sm:$0xff]  ;;  %v86_v25 = vld [vmem:[#allocation5 + $0xa0] sm:$0xff]  ;;  %v99_v29 = vld [vmem:[#allocation5 + $0x108] sm:$0xff] }
  0x68   :  { %1508 = vmatpush1.bf16.msra.mxu0 %v1507_v21  ;;  %1446 = vmatprep.subr.bf16.mxu1 %v1445_v22  ;;  %v1527_v21 = vpack.c.bf16 %v456_v11, %v450_v7  ;;  %v1593_v22 = vpack.c.bf16 %v87_v13, %v81_v12  ;;  %v468_v27 = vld [vmem:[#allocation5 + $0xc90] sm:$0xff]  ;;  %v475_v30 = vld [vmem:[#allocation5 + $0xcc8] sm:$0xff]  ;;  %v481_v31 = vld [vmem:[#allocation5 + $0xcf8] sm:$0xff] }
  0x69   :  { %1510 = vmatprep.subr.bf16.mxu0 %v1509_v26  ;;  %v1529_v26 = vpack.c.bf16 %v469_v15, %v463_v14  ;;  %v474_v35 = vld [vmem:[#allocation5 + $0xcc0] sm:$0xff]  ;;  %v92_v36 = vld [vmem:[#allocation5 + $0xd0] sm:$0xff]  ;;  %v105_v40 = vld [vmem:[#allocation5 + $0x138] sm:$0xff] }
  0x6a   :  { %v98_v37 = vld [vmem:[#allocation5 + $0x100] sm:$0xff]  ;;  %v480_v39 = vld [vmem:[#allocation5 + $0xcf0] sm:$0xff]  ;;  %v111_v41 = vld [vmem:[#allocation5 + $0x168] sm:$0xff] }
  0x6b   :  { %1448 = vmatpush1.bf16.msra.mxu1 %v1447_v32  ;;  %v1595_v32 = vpack.c.bf16 %v86_v25, %v80_v24  ;;  %v487_v42 = vld [vmem:[#allocation5 + $0xd28] sm:$0xff]  ;;  %v493_v43 = vld [vmem:[#allocation5 + $0xd58] sm:$0xff]  ;;  %v486_v47 = vld [vmem:[#allocation5 + $0xd20] sm:$0xff] }
  0x6c   :  { %1512 = vmatpush1.bf16.msra.mxu0 %v1511_v33  ;;  %1450 = vmatprep.subr.bf16.mxu1 %v1449_v34  ;;  %v1531_v33 = vpack.c.bf16 %v468_v27, %v462_v23  ;;  %v1597_v34 = vpack.c.bf16 %v99_v29, %v93_v28  ;;  %v104_v48 = vld [vmem:[#allocation5 + $0x130] sm:$0xff]  ;;  %v110_v49 = vld [vmem:[#allocation5 + $0x160] sm:$0xff]  ;;  %v117_v52 = vld [vmem:[#allocation5 + $0x198] sm:$0xff] }
  0x6d   :  { %1514 = vmatprep.subr.bf16.mxu0 %v1513_v38  ;;  %v1533_v38 = vpack.c.bf16 %v481_v31, %v475_v30  ;;  %v492_v51 = vld [vmem:[#allocation5 + $0xd50] sm:$0xff]  ;;  %v123_v53 = vld [vmem:[#allocation5 + $0x1c8] sm:$0xff]  ;;  %v505_v55 = vld [vmem:[#allocation5 + $0xdb8] sm:$0xff] }
  0x6e   :  { %v499_v54 = vld [vmem:[#allocation5 + $0xd88] sm:$0xff]  ;;  %v498_v59 = vld [vmem:[#allocation5 + $0xd80] sm:$0xff]  ;;  %v116_v60 = vld [vmem:[#allocation5 + $0x190] sm:$0xff] }
  0x6f   :  { %1452 = vmatpush1.bf16.msra.mxu1 %v1451_v44  ;;  %v1599_v44 = vpack.c.bf16 %v98_v37, %v92_v36  ;;  %v122_v61 = vld [vmem:[#allocation5 + $0x1c0] sm:$0xff]  ;;  %v504_v63 = vld [vmem:[#allocation5 + $0xdb0] sm:$0xff]  ;;  %v129_v0 = vld [vmem:[#allocation5 + $0x1f8] sm:$0xff] }
  0x70   :  { %1516 = vmatpush1.bf16.msra.mxu0 %v1515_v45  ;;  %1454 = vmatprep.subr.bf16.mxu1 %v1453_v46  ;;  %v1535_v45 = vpack.c.bf16 %v480_v39, %v474_v35  ;;  %v1601_v46 = vpack.c.bf16 %v111_v41, %v105_v40  ;;  %v135_v1 = vld [vmem:[#allocation5 + $0x228] sm:$0xff]  ;;  %v517_v3 = vld [vmem:[#allocation5 + $0xe18] sm:$0xff]  ;;  %v510_v7 = vld [vmem:[#allocation5 + $0xde0] sm:$0xff] }
  0x71   :  { %1518 = vmatprep.subr.bf16.mxu0 %v1517_v50  ;;  %v1537_v50 = vpack.c.bf16 %v493_v43, %v487_v42  ;;  %v511_v2 = vld [vmem:[#allocation5 + $0xde8] sm:$0xff]  ;;  %v128_v8 = vld [vmem:[#allocation5 + $0x1f0] sm:$0xff]  ;;  %v134_v9 = vld [vmem:[#allocation5 + $0x220] sm:$0xff] }
  0x72   :  { %v516_v11 = vld [vmem:[#allocation5 + $0xe10] sm:$0xff]  ;;  %v141_v12 = vld [vmem:[#allocation5 + $0x258] sm:$0xff]  ;;  %v147_v13 = vld [vmem:[#allocation5 + $0x288] sm:$0xff] }
  0x73   :  { %1456 = vmatpush1.bf16.msra.mxu1 %v1455_v56  ;;  %v1603_v56 = vpack.c.bf16 %v110_v49, %v104_v48  ;;  %v523_v14 = vld [vmem:[#allocation5 + $0xe48] sm:$0xff]  ;;  %v529_v15 = vld [vmem:[#allocation5 + $0xe78] sm:$0xff]  ;;  %v2238_v23 = vld [vmem:[#allocation2 + $0x30] sm:$0xff]  ;;  %v1547_v24 = vpack.c.bf16 %v516_v11, %v510_v7  ;;  %v1613_v25 = vpack.c.bf16 %v147_v13, %v141_v12 }
  0x74   :  { %1520 = vmatpush1.bf16.msra.mxu0 %v1519_v57  ;;  %1458 = vmatprep.subr.bf16.mxu1 %v1457_v58  ;;  %v1539_v57 = vpack.c.bf16 %v492_v51, %v486_v47  ;;  %v1605_v58 = vpack.c.bf16 %v123_v53, %v117_v52  ;;  %v146_v27 = vld [vmem:[#allocation5 + $0x280] sm:$0xff]  ;;  %v1549_v29 = vpack.c.bf16 %v529_v15, %v523_v14  ;;  %v528_v30 = vld [vmem:[#allocation5 + $0xe70] sm:$0xff]  ;;  %v153_v31 = vld [vmem:[#allocation5 + $0x2b8] sm:$0xff] }
  0x75   :  { %1522 = vmatprep.subr.bf16.mxu0 %v1521_v62  ;;  %v1541_v62 = vpack.c.bf16 %v505_v55, %v499_v54  ;;  %v2240_v28 = vld [vmem:[#allocation2 + $0x40] sm:$0xff]  ;;  %v2246_v36 = vld [vmem:[#allocation2 + $0x28] sm:$0xff]  ;;  %v152_v40 = vld [vmem:[#allocation5 + $0x2b0] sm:$0xff] }
  0x76   :  { %v534_v39 = vld [vmem:[#allocation5 + $0xea0] sm:$0xff]  ;;  %v540_v43 = vld [vmem:[#allocation5 + $0xed0] sm:$0xff]  ;;  %v553_v47 = vld [vmem:[#allocation5 + $0xf38] sm:$0xff] }
  0x77   :  { %1460 = vmatpush1.bf16.msra.mxu1 %v1459_v4  ;;  %v1607_v4 = vpack.c.bf16 %v122_v61, %v116_v60  ;;  %v158_v41 = vld [vmem:[#allocation5 + $0x2e0] sm:$0xff]  ;;  %v1555_v49 = vpack.c.bf16 %v540_v43, %v534_v39  ;;  %v164_v52 = vld [vmem:[#allocation5 + $0x310] sm:$0xff]  ;;  %v577_v7 = vld [vmem:[#allocation5 + $0xff8] sm:$0xff] }
  0x78   :  { %1524 = vmatpush1.bf16.msra.mxu0 %v1523_v5  ;;  %1590 = vmatprep.subr.bf16.mxu1 %v1589_v6  ;;  %v1543_v5 = vpack.c.bf16 %v504_v63, %v498_v59  ;;  %v1609_v6 = vpack.c.bf16 %v135_v1, %v129_v0  ;;  %v1619_v48 = vpack.c.bf16 %v158_v41, %v152_v40  ;;  %v546_v51 = vld [vmem:[#allocation5 + $0xf00] sm:$0xff]  ;;  %v552_v55 = vld [vmem:[#allocation5 + $0xf30] sm:$0xff]  ;;  %v565_v59 = vld [vmem:[#allocation5 + $0xf98] sm:$0xff] }
  0x79   :  { %1526 = vmatprep.subr.bf16.mxu0 %v1525_v10  ;;  %v1545_v10 = vpack.c.bf16 %v517_v3, %v511_v2  ;;  %v170_v53 = vld [vmem:[#allocation5 + $0x340] sm:$0xff]  ;;  %v1559_v61 = vpack.c.bf16 %v552_v55, %v546_v51  ;;  %v176_v0 = vld [vmem:[#allocation5 + $0x370] sm:$0xff]  ;;  %v601_v39 = vld [vmem:[#allocation5 + $0x10b8] sm:$0xff] }
  0x7a   :  { %739 = vmatmul.mubr.f32.vlgmr.msra.gmra.mrb[0].mxu1 %v2231_v17  ;;  %v1623_v60 = vpack.c.bf16 %v170_v53, %v164_v52  ;;  %v558_v63 = vld [vmem:[#allocation5 + $0xf60] sm:$0xff]  ;;  %v564_v3 = vld [vmem:[#allocation5 + $0xf90] sm:$0xff]  ;;  %v613_v51 = vld [vmem:[#allocation5 + $0x1118] sm:$0xff] }
  0x7b   :  { %816 = vmatmul.mubr.f32.vlgmr.msra.gmra.mrb[0].mxu0 %v56_v18  ;;  %1592 = vmatpush1.bf16.msra.mxu1 %v1591_v20  ;;  %v1611_v18 = vpack.c.bf16 %v134_v9, %v128_v8  ;;  %v522_v20 = vld [vmem:[#allocation5 + $0xe40] sm:$0xff]  ;;  %v1563_v9 = vpack.c.bf16 %v564_v3, %v558_v63  ;;  %v188_v12 = vld [vmem:[#allocation5 + $0x3d0] sm:$0xff]  ;;  %v625_v63 = vld [vmem:[#allocation5 + $0x1178] sm:$0xff] }
  0x7c   :  { %1528 = vmatpush1.bf16.msra.mxu0 %v1527_v21  ;;  %1594 = vmatprep.subr.bf16.mxu1 %v1593_v22  ;;  %v2234_v21 = vld [vmem:[#allocation2 + $0x38] sm:$0xff]  ;;  %v2236_v22 = vld [vmem:[#allocation2 + $0x48] sm:$0xff]  ;;  %v1551_v37 = vpack.c.bf16 %v528_v30, %v522_v20  ;;  %v182_v1 = vld [vmem:[#allocation5 + $0x3a0] sm:$0xff] }
  0x7d   :  { %1530 = vmatprep.subr.bf16.mxu0 %v1529_v26  ;;  %v140_v26 = vld [vmem:[#allocation5 + $0x250] sm:$0xff]  ;;  %744 = vmatprep.mubr.f32.mxu1 %v2234_v21  ;;  %v1627_v8 = vpack.c.bf16 %v182_v1, %v176_v0  ;;  %v570_v11 = vld [vmem:[#allocation5 + $0xfc0] sm:$0xff]  ;;  %v207_v20 = vld [vmem:[#allocation5 + $0x468] sm:$0xff] }
  0x7e   :  { %821 = vmatprep.mubr.f32.mxu0 %v2236_v22  ;;  %745 = vmatmul.mubr.f32.gmra.mrb[2].mxu1 %v2238_v23  ;;  %v1615_v35 = vpack.c.bf16 %v146_v27, %v140_v26  ;;  %v194_v13 = vld [vmem:[#allocation5 + $0x400] sm:$0xff]  ;;  %v576_v15 = vld [vmem:[#allocation5 + $0xff0] sm:$0xff] }
  0x7f   :  { %1596 = vmatpush1.bf16.msra.mxu1 %v1595_v32  ;;  %v159_v32 = vld [vmem:[#allocation5 + $0x2e8] sm:$0xff]  ;;  %822 = vmatmul.mubr.f32.gmra.mrb[2].mxu0 %v2240_v28  ;;  %v1631_v26 = vpack.c.bf16 %v194_v13, %v188_v12  ;;  %v1567_v27 = vpack.c.bf16 %v576_v15, %v570_v11  ;;  %v582_v30 = vld [vmem:[#allocation5 + $0x1020] sm:$0xff]  ;;  %v637_v11 = vld [vmem:[#allocation5 + $0x11d8] sm:$0xff] }
  0x80   :  { %1532 = vmatpush1.bf16.msra.mxu0 %v1531_v33  ;;  %1598 = vmatprep.subr.bf16.mxu1 %v1597_v34  ;;  %v535_v33 = vld [vmem:[#allocation5 + $0xea8] sm:$0xff]  ;;  %v541_v34 = vld [vmem:[#allocation5 + $0xed8] sm:$0xff]  ;;  %v594_v43 = vld [vmem:[#allocation5 + $0x1080] sm:$0xff] }
  0x81   :  { %1534 = vmatprep.subr.bf16.mxu0 %v1533_v38  ;;  %v1617_v38 = vpack.c.bf16 %v159_v32, %v153_v31  ;;  %v1553_v42 = vpack.c.bf16 %v541_v34, %v535_v33  ;;  %892 = vmatprep.mubr.f32.mxu0 %v2246_v36  ;;  %v200_v31 = vld [vmem:[#allocation5 + $0x430] sm:$0xff]  ;;  %v206_v32 = vld [vmem:[#allocation5 + $0x460] sm:$0xff] }
  0x82   :  { %969 = vmatprep.mubr.f32.mxu1 %v2225_v16  ;;  %v588_v34 = vld [vmem:[#allocation5 + $0x1050] sm:$0xff]  ;;  %v1635_v40 = vpack.c.bf16 %v206_v32, %v200_v31  ;;  %v606_v55 = vld [vmem:[#allocation5 + $0x10e0] sm:$0xff] }
  0x83   :  { %1600 = vmatpush1.bf16.msra.mxu1 %v1599_v44  ;;  %v165_v44 = vld [vmem:[#allocation5 + $0x318] sm:$0xff]  ;;  %v1571_v41 = vpack.c.bf16 %v588_v34, %v582_v30  ;;  %v618_v3 = vld [vmem:[#allocation5 + $0x1140] sm:$0xff]  ;;  %v260_v34 = vld [vmem:[#allocation5 + $0x610] sm:$0xff] }
  0x84   :  { %1536 = vmatpush1.bf16.msra.mxu0 %v1535_v45  ;;  %1602 = vmatprep.subr.bf16.mxu1 %v1601_v46  ;;  %v171_v45 = vld [vmem:[#allocation5 + $0x348] sm:$0xff]  ;;  %v630_v15 = vld [vmem:[#allocation5 + $0x11a0] sm:$0xff]  ;;  %v77_v30 = vld [vmem:[#allocation5 + $0x58] sm:$0xff] }
  0x85   :  { %1538 = vmatprep.subr.bf16.mxu0 %v1537_v50  ;;  %v547_v46 = vld [vmem:[#allocation5 + $0xf08] sm:$0xff]  ;;  %v1621_v50 = vpack.c.bf16 %v171_v45, %v165_v44  ;;  %v212_v44 = vld [vmem:[#allocation5 + $0x490] sm:$0xff]  ;;  %v218_v45 = vld [vmem:[#allocation5 + $0x4c0] sm:$0xff] }
  0x86   :  { %v1557_v54 = vpack.c.bf16 %v553_v47, %v547_v46  ;;  %v600_v47 = vld [vmem:[#allocation5 + $0x10b0] sm:$0xff]  ;;  %v1639_v52 = vpack.c.bf16 %v218_v45, %v212_v44  ;;  %v58_v44 = vld [vmem:[#allocation2 + $0x20] sm:$0xff] }
  0x87   :  { %1604 = vmatpush1.bf16.msra.mxu1 %v1603_v56  ;;  %v177_v56 = vld [vmem:[#allocation5 + $0x378] sm:$0xff]  ;;  %v1575_v53 = vpack.c.bf16 %v600_v47, %v594_v43 }
  0x88   :  { %1540 = vmatpush1.bf16.msra.mxu0 %v1539_v57  ;;  %1606 = vmatprep.subr.bf16.mxu1 %v1605_v58  ;;  %v183_v57 = vld [vmem:[#allocation5 + $0x3a8] sm:$0xff]  ;;  %v89_v43 = vld [vmem:[#allocation5 + $0xb8] sm:$0xff] }
  0x89   :  { %1542 = vmatprep.subr.bf16.mxu0 %v1541_v62  ;;  %v559_v58 = vld [vmem:[#allocation5 + $0xf68] sm:$0xff]  ;;  %v1625_v62 = vpack.c.bf16 %v183_v57, %v177_v56  ;;  %v224_v56 = vld [vmem:[#allocation5 + $0x4f0] sm:$0xff]  ;;  %v230_v57 = vld [vmem:[#allocation5 + $0x520] sm:$0xff] }
  0x8a   :  { %v1561_v2 = vpack.c.bf16 %v565_v59, %v559_v58  ;;  %v612_v59 = vld [vmem:[#allocation5 + $0x1110] sm:$0xff]  ;;  %v1643_v0 = vpack.c.bf16 %v230_v57, %v224_v56  ;;  %v95_v56 = vld [vmem:[#allocation5 + $0xe8] sm:$0xff]  ;;  %v101_v57 = vld [vmem:[#allocation5 + $0x118] sm:$0xff] }
  0x8b   :  { %1608 = vmatpush1.bf16.msra.mxu1 %v1607_v4  ;;  %v189_v4 = vld [vmem:[#allocation5 + $0x3d8] sm:$0xff]  ;;  %v1579_v1 = vpack.c.bf16 %v612_v59, %v606_v55  ;;  %v291_v55 = vld [vmem:[#allocation5 + $0x708] sm:$0xff] }
  0x8c   :  { %1544 = vmatpush1.bf16.msra.mxu0 %v1543_v5  ;;  %1610 = vmatprep.subr.bf16.mxu1 %v1609_v6  ;;  %v195_v5 = vld [vmem:[#allocation5 + $0x408] sm:$0xff] }
  0x8d   :  { %1546 = vmatprep.subr.bf16.mxu0 %v1545_v10  ;;  %v571_v6 = vld [vmem:[#allocation5 + $0xfc8] sm:$0xff]  ;;  %v1629_v10 = vpack.c.bf16 %v195_v5, %v189_v4  ;;  %v236_v4 = vld [vmem:[#allocation5 + $0x550] sm:$0xff]  ;;  %v242_v5 = vld [vmem:[#allocation5 + $0x580] sm:$0xff] }
  0x8e   :  { %v1565_v14 = vpack.c.bf16 %v577_v7, %v571_v6  ;;  %v624_v7 = vld [vmem:[#allocation5 + $0x1170] sm:$0xff]  ;;  %v1647_v12 = vpack.c.bf16 %v242_v5, %v236_v4  ;;  %v303_v4 = vld [vmem:[#allocation5 + $0x768] sm:$0xff]  ;;  %v113_v5 = vld [vmem:[#allocation5 + $0x178] sm:$0xff] }
  0x8f   :  { %1612 = vmatpush1.bf16.msra.mxu1 %v1611_v18  ;;  %v201_v18 = vld [vmem:[#allocation5 + $0x438] sm:$0xff]  ;;  %v1583_v13 = vpack.c.bf16 %v624_v7, %v618_v3 }
  0x90   :  { %1548 = vmatpush1.bf16.msra.mxu0 %v1547_v24  ;;  %1614 = vmatprep.subr.bf16.mxu1 %v1613_v25  ;;  %v583_v24 = vld [vmem:[#allocation5 + $0x1028] sm:$0xff]  ;;  %v589_v25 = vld [vmem:[#allocation5 + $0x1058] sm:$0xff] }
  0x91   :  { %1550 = vmatprep.subr.bf16.mxu0 %v1549_v29  ;;  %v1633_v29 = vpack.c.bf16 %v207_v20, %v201_v18  ;;  %v1569_v33 = vpack.c.bf16 %v589_v25, %v583_v24  ;;  %v248_v18 = vld [vmem:[#allocation5 + $0x5b0] sm:$0xff]  ;;  %v254_v20 = vld [vmem:[#allocation5 + $0x5e0] sm:$0xff]  ;;  %v297_v3 = vld [vmem:[#allocation5 + $0x738] sm:$0xff] }
  0x92   :  { %v636_v25 = vld [vmem:[#allocation5 + $0x11d0] sm:$0xff]  ;;  %v1651_v31 = vpack.c.bf16 %v254_v20, %v248_v18  ;;  %v119_v18 = vld [vmem:[#allocation5 + $0x1a8] sm:$0xff]  ;;  %v125_v20 = vld [vmem:[#allocation5 + $0x1d8] sm:$0xff] }
  0x93   :  { %1616 = vmatpush1.bf16.msra.mxu1 %v1615_v35  ;;  %v213_v35 = vld [vmem:[#allocation5 + $0x498] sm:$0xff]  ;;  %v1587_v32 = vpack.c.bf16 %v636_v25, %v630_v15  ;;  %v315_v15 = vld [vmem:[#allocation5 + $0x7c8] sm:$0xff] }
  0x94   :  { %1552 = vmatpush1.bf16.msra.mxu0 %v1551_v37  ;;  %1618 = vmatprep.subr.bf16.mxu1 %v1617_v38  ;;  %v219_v37 = vld [vmem:[#allocation5 + $0x4c8] sm:$0xff] }
  0x95   :  { %1554 = vmatprep.subr.bf16.mxu0 %v1553_v42  ;;  %v595_v38 = vld [vmem:[#allocation5 + $0x1088] sm:$0xff]  ;;  %v1637_v42 = vpack.c.bf16 %v219_v37, %v213_v35  ;;  %v266_v35 = vld [vmem:[#allocation5 + $0x640] sm:$0xff] }
  0x96   :  { %v1573_v46 = vpack.c.bf16 %v601_v39, %v595_v38  ;;  %v70_v38 = vld [vmem:[#allocation5 + $0x20] sm:$0xff]  ;;  %v76_v39 = vld [vmem:[#allocation5 + $0x50] sm:$0xff]  ;;  %v1655_v45 = vpack.c.bf16 %v266_v35, %v260_v34  ;;  %v327_v34 = vld [vmem:[#allocation5 + $0x828] sm:$0xff] }
  0x97   :  { %1620 = vmatpush1.bf16.msra.mxu1 %v1619_v48  ;;  %v225_v48 = vld [vmem:[#allocation5 + $0x4f8] sm:$0xff]  ;;  %v1783_v47 = vpack.c.bf16 %v76_v39, %v70_v38  ;;  %v131_v35 = vld [vmem:[#allocation5 + $0x208] sm:$0xff]  ;;  %v320_v39 = vld [vmem:[#allocation5 + $0x7f0] sm:$0xff] }
  0x98   :  { %1556 = vmatpush1.bf16.msra.mxu0 %v1555_v49  ;;  %1622 = vmatprep.subr.bf16.mxu1 %v1621_v50  ;;  %v231_v49 = vld [vmem:[#allocation5 + $0x528] sm:$0xff] }
  0x99   :  { %1558 = vmatprep.subr.bf16.mxu0 %v1557_v54  ;;  %v607_v50 = vld [vmem:[#allocation5 + $0x10e8] sm:$0xff]  ;;  %v1641_v54 = vpack.c.bf16 %v231_v49, %v225_v48  ;;  %v272_v48 = vld [vmem:[#allocation5 + $0x670] sm:$0xff]  ;;  %v278_v49 = vld [vmem:[#allocation5 + $0x6a0] sm:$0xff] }
  0x9a   :  { %v1577_v58 = vpack.c.bf16 %v613_v51, %v607_v50  ;;  %v82_v50 = vld [vmem:[#allocation5 + $0x80] sm:$0xff]  ;;  %v1659_v59 = vpack.c.bf16 %v278_v49, %v272_v48 }
  0x9b   :  { %1624 = vmatpush1.bf16.msra.mxu1 %v1623_v60  ;;  %v237_v60 = vld [vmem:[#allocation5 + $0x558] sm:$0xff] }
  0x9c   :  { %1560 = vmatpush1.bf16.msra.mxu0 %v1559_v61  ;;  %1626 = vmatprep.subr.bf16.mxu1 %v1625_v62  ;;  %v243_v61 = vld [vmem:[#allocation5 + $0x588] sm:$0xff] }
  0x9d   :  { %1562 = vmatprep.subr.bf16.mxu0 %v1561_v2  ;;  %v619_v62 = vld [vmem:[#allocation5 + $0x1148] sm:$0xff]  ;;  %v1645_v2 = vpack.c.bf16 %v243_v61, %v237_v60 }
  0x9e   :  { %v1581_v6 = vpack.c.bf16 %v625_v63, %v619_v62  ;;  %v284_v62 = vld [vmem:[#allocation5 + $0x6d0] sm:$0xff]  ;;  %v290_v63 = vld [vmem:[#allocation5 + $0x700] sm:$0xff] }
  0x9f   :  { %1628 = vmatpush1.bf16.msra.mxu1 %v1627_v8  ;;  %v249_v8 = vld [vmem:[#allocation5 + $0x5b8] sm:$0xff] }
  0xa0   :  { %1564 = vmatpush1.bf16.msra.mxu0 %v1563_v9  ;;  %1630 = vmatprep.subr.bf16.mxu1 %v1629_v10  ;;  %v255_v9 = vld [vmem:[#allocation5 + $0x5e8] sm:$0xff] }
  0xa1   :  { %1566 = vmatprep.subr.bf16.mxu0 %v1565_v14  ;;  %v631_v10 = vld [vmem:[#allocation5 + $0x11a8] sm:$0xff]  ;;  %v1649_v14 = vpack.c.bf16 %v255_v9, %v249_v8  ;;  %v1665_v8 = vpack.c.bf16 %v303_v4, %v297_v3  ;;  %v296_v9 = vld [vmem:[#allocation5 + $0x730] sm:$0xff]  ;;  %v357_v4 = vld [vmem:[#allocation5 + $0x918] sm:$0xff] }
  0xa2   :  { %v1585_v24 = vpack.c.bf16 %v637_v11, %v631_v10  ;;  %v302_v10 = vld [vmem:[#allocation5 + $0x760] sm:$0xff]  ;;  %v160_v3 = vld [vmem:[#allocation5 + $0x2f0] sm:$0xff] }
  0xa3   :  { %1632 = vmatpush1.bf16.msra.mxu1 %v1631_v26  ;;  %v261_v26 = vld [vmem:[#allocation5 + $0x618] sm:$0xff]  ;;  %v106_v11 = vld [vmem:[#allocation5 + $0x140] sm:$0xff] }
  0xa4   :  { %1568 = vmatpush1.bf16.msra.mxu0 %v1567_v27  ;;  %1634 = vmatprep.subr.bf16.mxu1 %v1633_v29  ;;  %v267_v27 = vld [vmem:[#allocation5 + $0x648] sm:$0xff] }
  0xa5   :  { %1570 = vmatprep.subr.bf16.mxu0 %v1569_v33  ;;  %v71_v29 = vld [vmem:[#allocation5 + $0x28] sm:$0xff]  ;;  %v1653_v33 = vpack.c.bf16 %v267_v27, %v261_v26  ;;  %v308_v27 = vld [vmem:[#allocation5 + $0x790] sm:$0xff] }
  0xa6   :  { %v1781_v37 = vpack.c.bf16 %v77_v30, %v71_v29  ;;  %v314_v29 = vld [vmem:[#allocation5 + $0x7c0] sm:$0xff] }
  0xa7   :  { %1636 = vmatpush1.bf16.msra.mxu1 %v1635_v40  ;;  %v273_v40 = vld [vmem:[#allocation5 + $0x678] sm:$0xff]  ;;  %v118_v30 = vld [vmem:[#allocation5 + $0x1a0] sm:$0xff] }
  0xa8   :  { %1572 = vmatpush1.bf16.msra.mxu0 %v1571_v41  ;;  %1638 = vmatprep.subr.bf16.mxu1 %v1637_v42  ;;  %v279_v41 = vld [vmem:[#allocation5 + $0x6a8] sm:$0xff] }
  0xa9   :  { %1574 = vmatprep.subr.bf16.mxu0 %v1573_v46  ;;  %v83_v42 = vld [vmem:[#allocation5 + $0x88] sm:$0xff]  ;;  %v65_v46 = vld [vmem:[#allocation2 + $0x58] sm:$0xff]  ;;  %v1657_v51 = vpack.c.bf16 %v279_v41, %v273_v40  ;;  %v326_v40 = vld [vmem:[#allocation5 + $0x820] sm:$0xff] }
  0xaa   :  { %v130_v41 = vld [vmem:[#allocation5 + $0x200] sm:$0xff]  ;;  %v1675_v48 = vpack.c.bf16 %v326_v40, %v320_v39  ;;  %v380_v40 = vld [vmem:[#allocation5 + $0x9d0] sm:$0xff] }
  0xab   :  { %1640 = vmatpush1.bf16.msra.mxu1 %v1639_v52  ;;  %v1785_v52 = vpack.c.bf16 %v89_v43, %v83_v42  ;;  %v136_v43 = vld [vmem:[#allocation5 + $0x230] sm:$0xff] }
  0xac   :  { %1576 = vmatpush1.bf16.msra.mxu0 %v1575_v53  ;;  %1642 = vmatprep.subr.bf16.mxu1 %v1641_v54  ;;  %v88_v53 = vld [vmem:[#allocation5 + $0xb0] sm:$0xff]  ;;  %v285_v54 = vld [vmem:[#allocation5 + $0x6d8] sm:$0xff]  ;;  %v1803_v49 = vpack.c.bf16 %v136_v43, %v130_v41  ;;  %v386_v41 = vld [vmem:[#allocation5 + $0xa00] sm:$0xff] }
  0xad   :  { %1578 = vmatprep.subr.bf16.mxu0 %v1577_v58  ;;  %v64_v58 = vld [vmem:[#allocation2 + $0x50] sm:$0xff]  ;;  %v1787_v60 = vpack.c.bf16 %v88_v53, %v82_v50  ;;  %v1661_v61 = vpack.c.bf16 %v291_v55, %v285_v54  ;;  %v142_v53 = vld [vmem:[#allocation5 + $0x260] sm:$0xff] }
  0xae   :  { %v148_v55 = vld [vmem:[#allocation5 + $0x290] sm:$0xff] }
  0xaf   :  { %1644 = vmatpush1.bf16.msra.mxu1 %v1643_v0  ;;  %v94_v0 = vld [vmem:[#allocation5 + $0xe0] sm:$0xff] }
  0xb0   :  { %1580 = vmatpush1.bf16.msra.mxu0 %v1579_v1  ;;  %1646 = vmatprep.subr.bf16.mxu1 %v1645_v2  ;;  %v1789_v1 = vpack.c.bf16 %v101_v57, %v95_v56  ;;  %v100_v2 = vld [vmem:[#allocation5 + $0x110] sm:$0xff]  ;;  %v345_v56 = vld [vmem:[#allocation5 + $0x8b8] sm:$0xff]  ;;  %v351_v57 = vld [vmem:[#allocation5 + $0x8e8] sm:$0xff] }
  0xb1   :  { %1582 = vmatprep.subr.bf16.mxu0 %v1581_v6  ;;  %v1663_v6 = vpack.c.bf16 %v290_v63, %v284_v62  ;;  %v1791_v7 = vpack.c.bf16 %v100_v2, %v94_v0  ;;  %v1681_v62 = vpack.c.bf16 %v351_v57, %v345_v56  ;;  %v344_v63 = vld [vmem:[#allocation5 + $0x8b0] sm:$0xff]  ;;  %v350_v0 = vld [vmem:[#allocation5 + $0x8e0] sm:$0xff]  ;;  %v405_v57 = vld [vmem:[#allocation5 + $0xa98] sm:$0xff] }
  0xb2   :  { %v208_v56 = vld [vmem:[#allocation5 + $0x470] sm:$0xff] }
  0xb3   :  { %1648 = vmatpush1.bf16.msra.mxu1 %v1647_v12 }
  0xb4   :  { %1584 = vmatpush1.bf16.msra.mxu0 %v1583_v13  ;;  %1650 = vmatprep.subr.bf16.mxu1 %v1649_v14  ;;  %v112_v13 = vld [vmem:[#allocation5 + $0x170] sm:$0xff]  ;;  %v309_v14 = vld [vmem:[#allocation5 + $0x798] sm:$0xff] }
  0xb5   :  { %1586 = vmatprep.subr.bf16.mxu0 %v1585_v24  ;;  %v1667_v24 = vpack.c.bf16 %v302_v10, %v296_v9  ;;  %v1795_v25 = vpack.c.bf16 %v112_v13, %v106_v11  ;;  %v1669_v26 = vpack.c.bf16 %v315_v15, %v309_v14  ;;  %v356_v10 = vld [vmem:[#allocation5 + $0x910] sm:$0xff]  ;;  %v362_v11 = vld [vmem:[#allocation5 + $0x940] sm:$0xff]  ;;  %v369_v15 = vld [vmem:[#allocation5 + $0x978] sm:$0xff] }
  0xb6   :  { %v172_v14 = vld [vmem:[#allocation5 + $0x350] sm:$0xff] }
  0xb7   :  { %1652 = vmatpush1.bf16.msra.mxu1 %v1651_v31  ;;  %v1797_v31 = vpack.c.bf16 %v125_v20, %v119_v18  ;;  %v375_v18 = vld [vmem:[#allocation5 + $0x9a8] sm:$0xff] }
  0xb8   :  { %1588 = vmatpush1.bf16.msra.mxu0 %v1587_v32  ;;  %1654 = vmatprep.subr.bf16.mxu1 %v1653_v33  ;;  %v124_v32 = vld [vmem:[#allocation5 + $0x1d0] sm:$0xff]  ;;  %v321_v33 = vld [vmem:[#allocation5 + $0x7f8] sm:$0xff]  ;;  %v179_v20 = vld [vmem:[#allocation5 + $0x388] sm:$0xff] }
  0xb9   :  { %1782 = vmatprep.subr.bf16.mxu0 %v1781_v37  ;;  %v137_v37 = vld [vmem:[#allocation5 + $0x238] sm:$0xff]  ;;  %v1673_v38 = vpack.c.bf16 %v327_v34, %v321_v33  ;;  %v184_v33 = vld [vmem:[#allocation5 + $0x3b0] sm:$0xff] }
  0xba   :  { %970 = vmatmul.mubr.f32.vlgmr.msra.gmra.mrb[4].mxu1 %v2231_v17  ;;  %v107_v17 = vld [vmem:[#allocation5 + $0x148] sm:$0xff]  ;;  %v1801_v42 = vpack.c.bf16 %v137_v37, %v131_v35  ;;  %v381_v34 = vld [vmem:[#allocation5 + $0x9d8] sm:$0xff] }
  0xbb   :  { %893 = vmatmul.mubr.f32.vlgmr.msra.gmra.mrb[0].mxu0 %v58_v44  ;;  %1656 = vmatpush1.bf16.msra.mxu1 %v1655_v45  ;;  %v1793_v12 = vpack.c.bf16 %v113_v5, %v107_v17  ;;  %v333_v44 = vld [vmem:[#allocation5 + $0x858] sm:$0xff]  ;;  %v339_v45 = vld [vmem:[#allocation5 + $0x888] sm:$0xff] }
  0xbc   :  { %1784 = vmatpush1.bf16.msra.mxu0 %v1783_v47  ;;  %898 = vmatprep.mubr.f32.mxu0 %v65_v46  ;;  %v143_v46 = vld [vmem:[#allocation5 + $0x268] sm:$0xff]  ;;  %v149_v47 = vld [vmem:[#allocation5 + $0x298] sm:$0xff]  ;;  %v1677_v50 = vpack.c.bf16 %v339_v45, %v333_v44  ;;  %v196_v44 = vld [vmem:[#allocation5 + $0x410] sm:$0xff] }
  0xbd   :  { %1658 = vmatprep.subr.bf16.mxu1 %v1657_v51  ;;  %1786 = vmatprep.subr.bf16.mxu0 %v1785_v52  ;;  %v332_v51 = vld [vmem:[#allocation5 + $0x850] sm:$0xff]  ;;  %v338_v52 = vld [vmem:[#allocation5 + $0x880] sm:$0xff]  ;;  %v1805_v54 = vpack.c.bf16 %v149_v47, %v143_v46  ;;  %v363_v17 = vld [vmem:[#allocation5 + $0x948] sm:$0xff] }
  0xbe   :  { %975 = vmatprep.mubr.f32.mxu1 %v2234_v21  ;;  %v167_v5 = vld [vmem:[#allocation5 + $0x328] sm:$0xff]  ;;  %v1685_v9 = vpack.c.bf16 %v363_v17, %v357_v4  ;;  %v393_v45 = vld [vmem:[#allocation5 + $0xa38] sm:$0xff]  ;;  %v220_v4 = vld [vmem:[#allocation5 + $0x4d0] sm:$0xff] }
  0xbf   :  { %899 = vmatmul.mubr.f32.gmra.mrb[2].mxu0 %v64_v58  ;;  %1660 = vmatpush1.bf16.msra.mxu1 %v1659_v59  ;;  %v155_v58 = vld [vmem:[#allocation5 + $0x2c8] sm:$0xff]  ;;  %v161_v59 = vld [vmem:[#allocation5 + $0x2f8] sm:$0xff] }
  0xc0   :  { %1788 = vmatpush1.bf16.msra.mxu0 %v1787_v60  ;;  %1662 = vmatprep.subr.bf16.mxu1 %v1661_v61  ;;  %v1679_v60 = vpack.c.bf16 %v338_v52, %v332_v51  ;;  %v1807_v61 = vpack.c.bf16 %v148_v55, %v142_v53  ;;  %v1809_v2 = vpack.c.bf16 %v161_v59, %v155_v58  ;;  %v387_v35 = vld [vmem:[#allocation5 + $0xa08] sm:$0xff]  ;;  %v392_v52 = vld [vmem:[#allocation5 + $0xa30] sm:$0xff]  ;;  %v398_v53 = vld [vmem:[#allocation5 + $0xa60] sm:$0xff] }
  0xc1   :  { %1790 = vmatprep.subr.bf16.mxu0 %v1789_v1  ;;  %976 = vmatmul.mubr.f32.gmra.mrb[6].mxu1 %v2238_v23  ;;  %v154_v1 = vld [vmem:[#allocation5 + $0x2c0] sm:$0xff]  ;;  %v191_v37 = vld [vmem:[#allocation5 + $0x3e8] sm:$0xff]  ;;  %v1693_v39 = vpack.c.bf16 %v387_v35, %v381_v34  ;;  %v417_v17 = vld [vmem:[#allocation5 + $0xaf8] sm:$0xff] }
  0xc2   :  { %1046 = vmatprep.mubr.f32.mxu1 %v2228_v19  ;;  %1200 = vmatprep.mubr.f32.mxu0 %v2225_v16  ;;  %v1671_v19 = vpack.c.bf16 %v314_v29, %v308_v27  ;;  %v1799_v16 = vpack.c.bf16 %v124_v32, %v118_v30  ;;  %v1689_v27 = vpack.c.bf16 %v375_v18, %v369_v15  ;;  %v368_v29 = vld [vmem:[#allocation5 + $0x970] sm:$0xff]  ;;  %v374_v30 = vld [vmem:[#allocation5 + $0x9a0] sm:$0xff]  ;;  %v399_v46 = vld [vmem:[#allocation5 + $0xa68] sm:$0xff] }
  0xc3   :  { %1664 = vmatpush1.bf16.msra.mxu1 %v1663_v6  ;;  %v173_v6 = vld [vmem:[#allocation5 + $0x358] sm:$0xff]  ;;  %v203_v47 = vld [vmem:[#allocation5 + $0x448] sm:$0xff]  ;;  %v1697_v51 = vpack.c.bf16 %v399_v46, %v393_v45  ;;  %v232_v15 = vld [vmem:[#allocation5 + $0x530] sm:$0xff] }
  0xc4   :  { %1792 = vmatpush1.bf16.msra.mxu0 %v1791_v7  ;;  %1666 = vmatprep.subr.bf16.mxu1 %v1665_v8  ;;  %v1683_v7 = vpack.c.bf16 %v350_v0, %v344_v63  ;;  %v1811_v8 = vpack.c.bf16 %v160_v3, %v154_v1  ;;  %v1813_v13 = vpack.c.bf16 %v173_v6, %v167_v5  ;;  %v411_v58 = vld [vmem:[#allocation5 + $0xac8] sm:$0xff]  ;;  %v404_v0 = vld [vmem:[#allocation5 + $0xa90] sm:$0xff]  ;;  %v410_v1 = vld [vmem:[#allocation5 + $0xac0] sm:$0xff] }
  0xc5   :  { %1794 = vmatprep.subr.bf16.mxu0 %v1793_v12  ;;  %v166_v12 = vld [vmem:[#allocation5 + $0x320] sm:$0xff]  ;;  %v215_v59 = vld [vmem:[#allocation5 + $0x4a8] sm:$0xff]  ;;  %v1701_v63 = vpack.c.bf16 %v411_v58, %v405_v57  ;;  %v429_v18 = vld [vmem:[#allocation5 + $0xb58] sm:$0xff] }
  0xc6   :  { %v423_v5 = vld [vmem:[#allocation5 + $0xb28] sm:$0xff]  ;;  %v244_v34 = vld [vmem:[#allocation5 + $0x590] sm:$0xff]  ;;  %v441_v35 = vld [vmem:[#allocation5 + $0xbb8] sm:$0xff] }
  0xc7   :  { %1668 = vmatpush1.bf16.msra.mxu1 %v1667_v24  ;;  %v185_v24 = vld [vmem:[#allocation5 + $0x3b8] sm:$0xff]  ;;  %v227_v6 = vld [vmem:[#allocation5 + $0x508] sm:$0xff]  ;;  %v256_v45 = vld [vmem:[#allocation5 + $0x5f0] sm:$0xff] }
  0xc8   :  { %1796 = vmatpush1.bf16.msra.mxu0 %v1795_v25  ;;  %1670 = vmatprep.subr.bf16.mxu1 %v1669_v26  ;;  %v1687_v25 = vpack.c.bf16 %v362_v11, %v356_v10  ;;  %v1815_v26 = vpack.c.bf16 %v172_v14, %v166_v12  ;;  %v1817_v32 = vpack.c.bf16 %v185_v24, %v179_v20  ;;  %v416_v11 = vld [vmem:[#allocation5 + $0xaf0] sm:$0xff]  ;;  %v422_v12 = vld [vmem:[#allocation5 + $0xb20] sm:$0xff]  ;;  %v435_v20 = vld [vmem:[#allocation5 + $0xb88] sm:$0xff] }
  0xc9   :  { %1798 = vmatprep.subr.bf16.mxu0 %v1797_v31  ;;  %v178_v31 = vld [vmem:[#allocation5 + $0x380] sm:$0xff]  ;;  %v1705_v10 = vpack.c.bf16 %v423_v5, %v417_v17  ;;  %v239_v24 = vld [vmem:[#allocation5 + $0x568] sm:$0xff]  ;;  %v453_v46 = vld [vmem:[#allocation5 + $0xc18] sm:$0xff] }
  0xca   :  { %v268_v57 = vld [vmem:[#allocation5 + $0x650] sm:$0xff]  ;;  %v465_v58 = vld [vmem:[#allocation5 + $0xc78] sm:$0xff] }
  0xcb   :  { %1672 = vmatpush1.bf16.msra.mxu1 %v1671_v19  ;;  %v197_v19 = vld [vmem:[#allocation5 + $0x418] sm:$0xff]  ;;  %v280_v17 = vld [vmem:[#allocation5 + $0x6b0] sm:$0xff] }
  0xcc   :  { %1800 = vmatpush1.bf16.msra.mxu0 %v1799_v16  ;;  %1674 = vmatprep.subr.bf16.mxu1 %v1673_v38  ;;  %v1691_v16 = vpack.c.bf16 %v374_v30, %v368_v29  ;;  %v1819_v38 = vpack.c.bf16 %v184_v33, %v178_v31  ;;  %v1821_v43 = vpack.c.bf16 %v197_v19, %v191_v37  ;;  %v428_v30 = vld [vmem:[#allocation5 + $0xb50] sm:$0xff]  ;;  %v434_v31 = vld [vmem:[#allocation5 + $0xb80] sm:$0xff]  ;;  %v447_v37 = vld [vmem:[#allocation5 + $0xbe8] sm:$0xff] }
  0xcd   :  { %1802 = vmatprep.subr.bf16.mxu0 %v1801_v42  ;;  %v190_v42 = vld [vmem:[#allocation5 + $0x3e0] sm:$0xff]  ;;  %v1709_v29 = vpack.c.bf16 %v435_v20, %v429_v18  ;;  %v251_v19 = vld [vmem:[#allocation5 + $0x5c8] sm:$0xff]  ;;  %v477_v5 = vld [vmem:[#allocation5 + $0xcd8] sm:$0xff] }
  0xce   :  { %v286_v18 = vld [vmem:[#allocation5 + $0x6e0] sm:$0xff] }
  0xcf   :  { %1676 = vmatpush1.bf16.msra.mxu1 %v1675_v48  ;;  %v209_v48 = vld [vmem:[#allocation5 + $0x478] sm:$0xff] }
  0xd0   :  { %1804 = vmatpush1.bf16.msra.mxu0 %v1803_v49  ;;  %1678 = vmatprep.subr.bf16.mxu1 %v1677_v50  ;;  %v1695_v49 = vpack.c.bf16 %v386_v41, %v380_v40  ;;  %v1823_v50 = vpack.c.bf16 %v196_v44, %v190_v42  ;;  %v1825_v55 = vpack.c.bf16 %v209_v48, %v203_v47  ;;  %v440_v41 = vld [vmem:[#allocation5 + $0xbb0] sm:$0xff]  ;;  %v446_v42 = vld [vmem:[#allocation5 + $0xbe0] sm:$0xff]  ;;  %v459_v47 = vld [vmem:[#allocation5 + $0xc48] sm:$0xff] }
  0xd1   :  { %1806 = vmatprep.subr.bf16.mxu0 %v1805_v54  ;;  %v202_v54 = vld [vmem:[#allocation5 + $0x440] sm:$0xff]  ;;  %v1713_v40 = vpack.c.bf16 %v447_v37, %v441_v35  ;;  %v263_v48 = vld [vmem:[#allocation5 + $0x628] sm:$0xff] }
  0xd2   :  { %v298_v35 = vld [vmem:[#allocation5 + $0x740] sm:$0xff] }
  0xd3   :  { %1680 = vmatpush1.bf16.msra.mxu1 %v1679_v60  ;;  %v221_v60 = vld [vmem:[#allocation5 + $0x4d8] sm:$0xff] }
  0xd4   :  { %1808 = vmatpush1.bf16.msra.mxu0 %v1807_v61  ;;  %1682 = vmatprep.subr.bf16.mxu1 %v1681_v62  ;;  %v1699_v61 = vpack.c.bf16 %v398_v53, %v392_v52  ;;  %v1827_v62 = vpack.c.bf16 %v208_v56, %v202_v54  ;;  %v1829_v3 = vpack.c.bf16 %v221_v60, %v215_v59  ;;  %v452_v53 = vld [vmem:[#allocation5 + $0xc10] sm:$0xff]  ;;  %v458_v54 = vld [vmem:[#allocation5 + $0xc40] sm:$0xff]  ;;  %v471_v59 = vld [vmem:[#allocation5 + $0xca8] sm:$0xff] }
  0xd5   :  { %1810 = vmatprep.subr.bf16.mxu0 %v1809_v2  ;;  %v214_v2 = vld [vmem:[#allocation5 + $0x4a0] sm:$0xff]  ;;  %v1717_v52 = vpack.c.bf16 %v459_v47, %v453_v46  ;;  %v275_v60 = vld [vmem:[#allocation5 + $0x688] sm:$0xff]  ;;  %v513_v46 = vld [vmem:[#allocation5 + $0xdf8] sm:$0xff] }
  0xd6   :  { %v519_v47 = vld [vmem:[#allocation5 + $0xe28] sm:$0xff] }
  0xd7   :  { %1684 = vmatpush1.bf16.msra.mxu1 %v1683_v7  ;;  %v233_v7 = vld [vmem:[#allocation5 + $0x538] sm:$0xff] }
  0xd8   :  { %1812 = vmatpush1.bf16.msra.mxu0 %v1811_v8  ;;  %1686 = vmatprep.subr.bf16.mxu1 %v1685_v9  ;;  %v1703_v8 = vpack.c.bf16 %v410_v1, %v404_v0  ;;  %v1831_v9 = vpack.c.bf16 %v220_v4, %v214_v2  ;;  %v1833_v14 = vpack.c.bf16 %v233_v7, %v227_v6  ;;  %v464_v1 = vld [vmem:[#allocation5 + $0xc70] sm:$0xff]  ;;  %v470_v2 = vld [vmem:[#allocation5 + $0xca0] sm:$0xff]  ;;  %v483_v6 = vld [vmem:[#allocation5 + $0xd08] sm:$0xff] }
  0xd9   :  { %1814 = vmatprep.subr.bf16.mxu0 %v1813_v13  ;;  %v226_v13 = vld [vmem:[#allocation5 + $0x500] sm:$0xff]  ;;  %v1721_v0 = vpack.c.bf16 %v471_v59, %v465_v58  ;;  %v2255_v7 = vld [vmem:[#allocation2 + $0x10] sm:$0xff]  ;;  %v531_v58 = vld [vmem:[#allocation5 + $0xe88] sm:$0xff] }
  0xda   :  { %v335_v59 = vld [vmem:[#allocation5 + $0x868] sm:$0xff] }
  0xdb   :  { %1688 = vmatpush1.bf16.msra.mxu1 %v1687_v25  ;;  %v245_v25 = vld [vmem:[#allocation5 + $0x598] sm:$0xff] }
  0xdc   :  { %1816 = vmatpush1.bf16.msra.mxu0 %v1815_v26  ;;  %1690 = vmatprep.subr.bf16.mxu1 %v1689_v27  ;;  %v1707_v26 = vpack.c.bf16 %v422_v12, %v416_v11  ;;  %v1835_v27 = vpack.c.bf16 %v232_v15, %v226_v13  ;;  %v1837_v33 = vpack.c.bf16 %v245_v25, %v239_v24  ;;  %v482_v15 = vld [vmem:[#allocation5 + $0xd00] sm:$0xff]  ;;  %v292_v24 = vld [vmem:[#allocation5 + $0x710] sm:$0xff]  ;;  %v489_v25 = vld [vmem:[#allocation5 + $0xd38] sm:$0xff] }
  0xdd   :  { %1818 = vmatprep.subr.bf16.mxu0 %v1817_v32  ;;  %v238_v32 = vld [vmem:[#allocation5 + $0x560] sm:$0xff]  ;;  %v1723_v11 = vpack.c.bf16 %v470_v2, %v464_v1  ;;  %v1725_v13 = vpack.c.bf16 %v483_v6, %v477_v5  ;;  %v543_v5 = vld [vmem:[#allocation5 + $0xee8] sm:$0xff] }
  0xde   :  { %v530_v1 = vld [vmem:[#allocation5 + $0xe80] sm:$0xff]  ;;  %v347_v6 = vld [vmem:[#allocation5 + $0x8c8] sm:$0xff] }
  0xdf   :  { %1692 = vmatpush1.bf16.msra.mxu1 %v1691_v16  ;;  %v257_v16 = vld [vmem:[#allocation5 + $0x5f8] sm:$0xff]  ;;  %v334_v2 = vld [vmem:[#allocation5 + $0x860] sm:$0xff] }
  0xe0   :  { %1820 = vmatpush1.bf16.msra.mxu0 %v1819_v38  ;;  %1694 = vmatprep.subr.bf16.mxu1 %v1693_v39  ;;  %v1711_v38 = vpack.c.bf16 %v434_v31, %v428_v30  ;;  %v1839_v39 = vpack.c.bf16 %v244_v34, %v238_v32  ;;  %v1841_v44 = vpack.c.bf16 %v257_v16, %v251_v19  ;;  %v494_v34 = vld [vmem:[#allocation5 + $0xd60] sm:$0xff]  ;;  %v501_v19 = vld [vmem:[#allocation5 + $0xd98] sm:$0xff]  ;;  %v507_v16 = vld [vmem:[#allocation5 + $0xdc8] sm:$0xff] }
  0xe1   :  { %1822 = vmatprep.subr.bf16.mxu0 %v1821_v43  ;;  %v250_v43 = vld [vmem:[#allocation5 + $0x5c0] sm:$0xff]  ;;  %v1855_v31 = vpack.c.bf16 %v292_v24, %v286_v18  ;;  %v352_v18 = vld [vmem:[#allocation5 + $0x8f0] sm:$0xff]  ;;  %v555_v24 = vld [vmem:[#allocation5 + $0xf48] sm:$0xff] }
  0xe3   :  { %1696 = vmatpush1.bf16.msra.mxu1 %v1695_v49  ;;  %v269_v49 = vld [vmem:[#allocation5 + $0x658] sm:$0xff] }
  0xe4   :  { %1824 = vmatpush1.bf16.msra.mxu0 %v1823_v50  ;;  %1698 = vmatprep.subr.bf16.mxu1 %v1697_v51  ;;  %v1715_v50 = vpack.c.bf16 %v446_v42, %v440_v41  ;;  %v1843_v51 = vpack.c.bf16 %v256_v45, %v250_v43  ;;  %v1845_v56 = vpack.c.bf16 %v269_v49, %v263_v48  ;;  %v500_v41 = vld [vmem:[#allocation5 + $0xd90] sm:$0xff]  ;;  %v506_v42 = vld [vmem:[#allocation5 + $0xdc0] sm:$0xff]  ;;  %v323_v48 = vld [vmem:[#allocation5 + $0x808] sm:$0xff] }
  0xe5   :  { %1826 = vmatprep.subr.bf16.mxu0 %v1825_v55  ;;  %v262_v55 = vld [vmem:[#allocation5 + $0x620] sm:$0xff]  ;;  %v316_v45 = vld [vmem:[#allocation5 + $0x7d0] sm:$0xff]  ;;  %v1735_v49 = vpack.c.bf16 %v506_v42, %v500_v41 }
  0xe6   :  { %v310_v43 = vld [vmem:[#allocation5 + $0x7a0] sm:$0xff]  ;;  %v376_v42 = vld [vmem:[#allocation5 + $0x9b0] sm:$0xff] }
  0xe7   :  { %1700 = vmatpush1.bf16.msra.mxu1 %v1699_v61  ;;  %v281_v61 = vld [vmem:[#allocation5 + $0x6b8] sm:$0xff] }
  0xe8   :  { %1828 = vmatpush1.bf16.msra.mxu0 %v1827_v62  ;;  %1702 = vmatprep.subr.bf16.mxu1 %v1701_v63  ;;  %v1719_v62 = vpack.c.bf16 %v458_v54, %v452_v53  ;;  %v1847_v63 = vpack.c.bf16 %v268_v57, %v262_v55  ;;  %v1849_v4 = vpack.c.bf16 %v281_v61, %v275_v60  ;;  %v518_v53 = vld [vmem:[#allocation5 + $0xe20] sm:$0xff]  ;;  %v525_v57 = vld [vmem:[#allocation5 + $0xe58] sm:$0xff] }
  0xe9   :  { %1830 = vmatprep.subr.bf16.mxu0 %v1829_v3  ;;  %v274_v3 = vld [vmem:[#allocation5 + $0x680] sm:$0xff]  ;;  %v341_v60 = vld [vmem:[#allocation5 + $0x898] sm:$0xff] }
  0xea   :  { %v1851_v12 = vpack.c.bf16 %v280_v17, %v274_v3  ;;  %v322_v54 = vld [vmem:[#allocation5 + $0x800] sm:$0xff]  ;;  %v1869_v3 = vpack.c.bf16 %v341_v60, %v335_v59  ;;  %v537_v17 = vld [vmem:[#allocation5 + $0xeb8] sm:$0xff] }
  0xeb   :  { %1704 = vmatpush1.bf16.msra.mxu1 %v1703_v8  ;;  %v287_v8 = vld [vmem:[#allocation5 + $0x6e8] sm:$0xff] }
  0xec   :  { %1832 = vmatpush1.bf16.msra.mxu0 %v1831_v9  ;;  %1706 = vmatprep.subr.bf16.mxu1 %v1705_v10  ;;  %v293_v9 = vld [vmem:[#allocation5 + $0x718] sm:$0xff]  ;;  %v2048_v10 = vld [vmem:[#allocation2] sm:$0xff] }
  0xed   :  { %1834 = vmatprep.subr.bf16.mxu0 %v1833_v14  ;;  %v476_v14 = vld [vmem:[#allocation5 + $0xcd0] sm:$0xff]  ;;  %v1853_v20 = vpack.c.bf16 %v293_v9, %v287_v8  ;;  %v353_v8 = vld [vmem:[#allocation5 + $0x8f8] sm:$0xff] }
  0xee   :  { %v1727_v30 = vpack.c.bf16 %v482_v15, %v476_v14  ;;  %v346_v14 = vld [vmem:[#allocation5 + $0x8c0] sm:$0xff]  ;;  %v1873_v15 = vpack.c.bf16 %v353_v8, %v347_v6 }
  0xef   :  { %1708 = vmatpush1.bf16.msra.mxu1 %v1707_v26  ;;  %v495_v26 = vld [vmem:[#allocation5 + $0xd68] sm:$0xff] }
  0xf0   :  { %1836 = vmatpush1.bf16.msra.mxu0 %v1835_v27  ;;  %1710 = vmatprep.subr.bf16.mxu1 %v1709_v29  ;;  %v299_v27 = vld [vmem:[#allocation5 + $0x748] sm:$0xff]  ;;  %v305_v29 = vld [vmem:[#allocation5 + $0x778] sm:$0xff]  ;;  %v1729_v32 = vpack.c.bf16 %v495_v26, %v489_v25 }
  0xf1   :  { %1838 = vmatprep.subr.bf16.mxu0 %v1837_v33  ;;  %v488_v33 = vld [vmem:[#allocation5 + $0xd30] sm:$0xff]  ;;  %v1857_v37 = vpack.c.bf16 %v305_v29, %v299_v27  ;;  %v359_v25 = vld [vmem:[#allocation5 + $0x928] sm:$0xff]  ;;  %v365_v26 = vld [vmem:[#allocation5 + $0x958] sm:$0xff]  ;;  %v1875_v29 = vpack.c.bf16 %v352_v18, %v346_v14 }
  0xf2   :  { %v609_v14 = vld [vmem:[#allocation5 + $0x10f8] sm:$0xff]  ;;  %v419_v18 = vld [vmem:[#allocation5 + $0xb08] sm:$0xff] }
  0xf3   :  { %1712 = vmatpush1.bf16.msra.mxu1 %v1711_v38  ;;  %v2049_v38 = vld [vmem:[#allocation2 + $0x18] sm:$0xff] }
  0xf4   :  { %1840 = vmatpush1.bf16.msra.mxu0 %v1839_v39  ;;  %1714 = vmatprep.subr.bf16.mxu1 %v1713_v40  ;;  %v1733_v40 = vpack.c.bf16 %v507_v16, %v501_v19  ;;  %v371_v19 = vld [vmem:[#allocation5 + $0x988] sm:$0xff]  ;;  %v377_v16 = vld [vmem:[#allocation5 + $0x9b8] sm:$0xff] }
  0xf5   :  { %1842 = vmatprep.subr.bf16.mxu0 %v1841_v44  ;;  %v1881_v41 = vpack.c.bf16 %v377_v16, %v371_v19 }
  0xf7   :  { %1716 = vmatpush1.bf16.msra.mxu1 %v1715_v50  ;;  %v1863_v50 = vpack.c.bf16 %v316_v45, %v310_v43  ;;  %v573_v43 = vld [vmem:[#allocation5 + $0xfd8] sm:$0xff]  ;;  %v383_v45 = vld [vmem:[#allocation5 + $0x9e8] sm:$0xff] }
  0xf8   :  { %1844 = vmatpush1.bf16.msra.mxu0 %v1843_v51  ;;  %1718 = vmatprep.subr.bf16.mxu1 %v1717_v52  ;;  %v1737_v51 = vpack.c.bf16 %v519_v47, %v513_v46  ;;  %v512_v52 = vld [vmem:[#allocation5 + $0xdf0] sm:$0xff]  ;;  %v389_v46 = vld [vmem:[#allocation5 + $0xa18] sm:$0xff] }
  0xf9   :  { %1846 = vmatprep.subr.bf16.mxu0 %v1845_v56  ;;  %v328_v56 = vld [vmem:[#allocation5 + $0x830] sm:$0xff]  ;;  %v1739_v61 = vpack.c.bf16 %v518_v53, %v512_v52  ;;  %v1885_v52 = vpack.c.bf16 %v389_v46, %v383_v45 }
  0xfa   :  { %1047 = vmatmul.mubr.f32.vlgmr.msra.gmra.mrb[4].mxu1 %v2255_v7  ;;  %v388_v53 = vld [vmem:[#allocation5 + $0xa10] sm:$0xff] }
  0xfb   :  { %1720 = vmatpush1.bf16.msra.mxu1 %v1719_v62  ;;  %1201 = vmatmul.mubr.f32.vlgmr.msra.gmra.mrb[4].mxu0 %v2048_v10  ;;  %v1867_v62 = vpack.c.bf16 %v328_v56, %v322_v54  ;;  %v585_v54 = vld [vmem:[#allocation5 + $0x1038] sm:$0xff]  ;;  %v395_v56 = vld [vmem:[#allocation5 + $0xa48] sm:$0xff] }
  0xfc   :  { %1848 = vmatpush1.bf16.msra.mxu0 %v1847_v63  ;;  %1722 = vmatprep.subr.bf16.mxu1 %v1721_v0  ;;  %v1741_v63 = vpack.c.bf16 %v531_v58, %v525_v57  ;;  %v524_v0 = vld [vmem:[#allocation5 + $0xe50] sm:$0xff]  ;;  %v401_v57 = vld [vmem:[#allocation5 + $0xa78] sm:$0xff] }
  0xfd   :  { %1850 = vmatprep.subr.bf16.mxu0 %v1849_v4  ;;  %1052 = vmatprep.mubr.f32.mxu1 %v2236_v22  ;;  %v304_v22 = vld [vmem:[#allocation5 + $0x770] sm:$0xff]  ;;  %v1743_v9 = vpack.c.bf16 %v530_v1, %v524_v0  ;;  %v1889_v0 = vpack.c.bf16 %v401_v57, %v395_v56  ;;  %v454_v56 = vld [vmem:[#allocation5 + $0xc20] sm:$0xff] }
  0xfe   :  { %1206 = vmatprep.mubr.f32.mxu0 %v2234_v21  ;;  %1053 = vmatmul.mubr.f32.gmra.mrb[6].mxu1 %v2240_v28  ;;  %v311_v21 = vld [vmem:[#allocation5 + $0x7a8] sm:$0xff]  ;;  %v317_v28 = vld [vmem:[#allocation5 + $0x7d8] sm:$0xff]  ;;  %v1859_v39 = vpack.c.bf16 %v304_v22, %v298_v35  ;;  %v340_v4 = vld [vmem:[#allocation5 + $0x890] sm:$0xff] }
  0xff   :  { %1724 = vmatpush1.bf16.msra.mxu1 %v1723_v11  ;;  %1207 = vmatmul.mubr.f32.gmra.mrb[6].mxu0 %v2238_v23  ;;  %v1731_v23 = vpack.c.bf16 %v494_v34, %v488_v33  ;;  %v1861_v44 = vpack.c.bf16 %v317_v28, %v311_v21  ;;  %v1871_v10 = vpack.c.bf16 %v340_v4, %v334_v2  ;;  %v358_v33 = vld [vmem:[#allocation5 + $0x920] sm:$0xff]  ;;  %v364_v35 = vld [vmem:[#allocation5 + $0x950] sm:$0xff]  ;;  %v567_v22 = vld [vmem:[#allocation5 + $0xfa8] sm:$0xff] }
 0x100   :  { %1852 = vmatpush1.bf16.msra.mxu0 %v1851_v12  ;;  %1726 = vmatprep.subr.bf16.mxu1 %v1725_v13  ;;  %v1745_v11 = vpack.c.bf16 %v543_v5, %v537_v17  ;;  %v536_v12 = vld [vmem:[#allocation5 + $0xeb0] sm:$0xff]  ;;  %v542_v13 = vld [vmem:[#allocation5 + $0xee0] sm:$0xff]  ;;  %v1877_v34 = vpack.c.bf16 %v365_v26, %v359_v25  ;;  %v1879_v28 = vpack.c.bf16 %v364_v35, %v358_v33  ;;  %v597_v2 = vld [vmem:[#allocation5 + $0x1098] sm:$0xff] }
 0x101   :  { %1854 = vmatprep.subr.bf16.mxu0 %v1853_v20  ;;  %1123 = vmatprep.mubr.f32.mxu1 %v2246_v36  ;;  %v329_v36 = vld [vmem:[#allocation5 + $0x838] sm:$0xff]  ;;  %v1747_v27 = vpack.c.bf16 %v542_v13, %v536_v12  ;;  %v400_v1 = vld [vmem:[#allocation5 + $0xa70] sm:$0xff]  ;;  %v407_v4 = vld [vmem:[#allocation5 + $0xaa8] sm:$0xff] }
 0x102   :  { %1277 = vmatprep.mubr.f32.mxu0 %v2049_v38  ;;  %v1865_v55 = vpack.c.bf16 %v329_v36, %v323_v48  ;;  %v549_v20 = vld [vmem:[#allocation5 + $0xf18] sm:$0xff]  ;;  %v412_v13 = vld [vmem:[#allocation5 + $0xad0] sm:$0xff]  ;;  %v431_v35 = vld [vmem:[#allocation5 + $0xb68] sm:$0xff] }
 0x103   :  { %1728 = vmatpush1.bf16.msra.mxu1 %v1727_v30  ;;  %v1749_v30 = vpack.c.bf16 %v555_v24, %v549_v20  ;;  %v413_v17 = vld [vmem:[#allocation5 + $0xad8] sm:$0xff]  ;;  %v460_v57 = vld [vmem:[#allocation5 + $0xc50] sm:$0xff] }
 0x104   :  { %1856 = vmatpush1.bf16.msra.mxu0 %v1855_v31  ;;  %1730 = vmatprep.subr.bf16.mxu1 %v1729_v32  ;;  %v548_v31 = vld [vmem:[#allocation5 + $0xf10] sm:$0xff]  ;;  %v554_v32 = vld [vmem:[#allocation5 + $0xf40] sm:$0xff]  ;;  %v1893_v12 = vpack.c.bf16 %v413_v17, %v407_v4  ;;  %v425_v20 = vld [vmem:[#allocation5 + $0xb38] sm:$0xff] }
 0x105   :  { %1858 = vmatprep.subr.bf16.mxu0 %v1857_v37  ;;  %v561_v37 = vld [vmem:[#allocation5 + $0xf78] sm:$0xff]  ;;  %v1751_v21 = vpack.c.bf16 %v554_v32, %v548_v31  ;;  %v1897_v31 = vpack.c.bf16 %v425_v20, %v419_v18  ;;  %v424_v32 = vld [vmem:[#allocation5 + $0xb30] sm:$0xff]  ;;  %v503_v18 = vld [vmem:[#allocation5 + $0xda8] sm:$0xff] }
 0x106   :  { %v1753_v38 = vpack.c.bf16 %v567_v22, %v561_v37  ;;  %v621_v33 = vld [vmem:[#allocation5 + $0x1158] sm:$0xff] }
 0x107   :  { %1732 = vmatpush1.bf16.msra.mxu1 %v1731_v23  ;;  %v560_v23 = vld [vmem:[#allocation5 + $0xf70] sm:$0xff]  ;;  %v437_v37 = vld [vmem:[#allocation5 + $0xb98] sm:$0xff] }
 0x108   :  { %1860 = vmatpush1.bf16.msra.mxu0 %v1859_v39  ;;  %1734 = vmatprep.subr.bf16.mxu1 %v1733_v40  ;;  %v566_v39 = vld [vmem:[#allocation5 + $0xfa0] sm:$0xff]  ;;  %v2051_v4 = vld [vmem:[#allocation2 + $0x58] sm:$0xff] }
 0x109   :  { %1862 = vmatprep.subr.bf16.mxu0 %v1861_v44  ;;  %v370_v40 = vld [vmem:[#allocation5 + $0x980] sm:$0xff]  ;;  %v579_v44 = vld [vmem:[#allocation5 + $0x1008] sm:$0xff]  ;;  %v1755_v47 = vpack.c.bf16 %v566_v39, %v560_v23  ;;  %v1901_v23 = vpack.c.bf16 %v437_v37, %v431_v35  ;;  %v436_v39 = vld [vmem:[#allocation5 + $0xb90] sm:$0xff] }
 0x10a   :  { %v1883_v48 = vpack.c.bf16 %v376_v42, %v370_v40  ;;  %v1757_v36 = vpack.c.bf16 %v579_v44, %v573_v43  ;;  %v633_v40 = vld [vmem:[#allocation5 + $0x11b8] sm:$0xff]  ;;  %v443_v42 = vld [vmem:[#allocation5 + $0xbc8] sm:$0xff]  ;;  %v520_v35 = vld [vmem:[#allocation5 + $0xe30] sm:$0xff] }
 0x10b   :  { %1736 = vmatpush1.bf16.msra.mxu1 %v1735_v49  ;;  %v572_v49 = vld [vmem:[#allocation5 + $0xfd0] sm:$0xff]  ;;  %v449_v43 = vld [vmem:[#allocation5 + $0xbf8] sm:$0xff]  ;;  %v527_v37 = vld [vmem:[#allocation5 + $0xe68] sm:$0xff] }
 0x10c   :  { %1864 = vmatpush1.bf16.msra.mxu0 %v1863_v50  ;;  %1738 = vmatprep.subr.bf16.mxu1 %v1737_v51  ;;  %v578_v50 = vld [vmem:[#allocation5 + $0x1000] sm:$0xff]  ;;  %v509_v20 = vld [vmem:[#allocation5 + $0xdd8] sm:$0xff] }
 0x10d   :  { %1866 = vmatprep.subr.bf16.mxu0 %v1865_v55  ;;  %v382_v51 = vld [vmem:[#allocation5 + $0x9e0] sm:$0xff]  ;;  %v591_v55 = vld [vmem:[#allocation5 + $0x1068] sm:$0xff]  ;;  %v1759_v58 = vpack.c.bf16 %v578_v50, %v572_v49  ;;  %v1905_v49 = vpack.c.bf16 %v449_v43, %v443_v42  ;;  %v448_v50 = vld [vmem:[#allocation5 + $0xbf0] sm:$0xff] }
 0x10e   :  { %v1887_v59 = vpack.c.bf16 %v388_v53, %v382_v51  ;;  %v1761_v60 = vpack.c.bf16 %v591_v55, %v585_v54  ;;  %v455_v51 = vld [vmem:[#allocation5 + $0xc28] sm:$0xff]  ;;  %v538_v43 = vld [vmem:[#allocation5 + $0xec0] sm:$0xff] }
 0x10f   :  { %1740 = vmatpush1.bf16.msra.mxu1 %v1739_v61  ;;  %v584_v61 = vld [vmem:[#allocation5 + $0x1030] sm:$0xff] }
 0x110   :  { %1868 = vmatpush1.bf16.msra.mxu0 %v1867_v62  ;;  %1742 = vmatprep.subr.bf16.mxu1 %v1741_v63  ;;  %v590_v62 = vld [vmem:[#allocation5 + $0x1060] sm:$0xff] }
 0x111   :  { %1870 = vmatprep.subr.bf16.mxu0 %v1869_v3  ;;  %v394_v63 = vld [vmem:[#allocation5 + $0xa40] sm:$0xff]  ;;  %v603_v3 = vld [vmem:[#allocation5 + $0x10c8] sm:$0xff]  ;;  %v1763_v5 = vpack.c.bf16 %v590_v62, %v584_v61  ;;  %v472_v62 = vld [vmem:[#allocation5 + $0xcb0] sm:$0xff] }
 0x112   :  { %v1891_v6 = vpack.c.bf16 %v400_v1, %v394_v63  ;;  %v1765_v8 = vpack.c.bf16 %v603_v3, %v597_v2  ;;  %v466_v61 = vld [vmem:[#allocation5 + $0xc80] sm:$0xff]  ;;  %v485_v1 = vld [vmem:[#allocation5 + $0xd18] sm:$0xff] }
 0x113   :  { %1744 = vmatpush1.bf16.msra.mxu1 %v1743_v9  ;;  %v596_v9 = vld [vmem:[#allocation5 + $0x1090] sm:$0xff]  ;;  %v2263_v2 = vld [vmem:[#allocation2 + $0x20] sm:$0xff]  ;;  %v1915_v3 = vpack.c.bf16 %v472_v62, %v466_v61  ;;  %v587_v62 = vld [vmem:[#allocation5 + $0x1048] sm:$0xff] }
 0x114   :  { %1872 = vmatpush1.bf16.msra.mxu0 %v1871_v10  ;;  %1746 = vmatprep.subr.bf16.mxu1 %v1745_v11  ;;  %v602_v10 = vld [vmem:[#allocation5 + $0x10c0] sm:$0xff]  ;;  %v580_v61 = vld [vmem:[#allocation5 + $0x1010] sm:$0xff] }
 0x115   :  { %1874 = vmatprep.subr.bf16.mxu0 %v1873_v15  ;;  %v406_v11 = vld [vmem:[#allocation5 + $0xaa0] sm:$0xff]  ;;  %v615_v15 = vld [vmem:[#allocation5 + $0x1128] sm:$0xff]  ;;  %v1767_v24 = vpack.c.bf16 %v602_v10, %v596_v9  ;;  %v497_v10 = vld [vmem:[#allocation5 + $0xd78] sm:$0xff] }
 0x116   :  { %v1895_v25 = vpack.c.bf16 %v412_v13, %v406_v11  ;;  %v1769_v26 = vpack.c.bf16 %v615_v15, %v609_v14  ;;  %v491_v9 = vld [vmem:[#allocation5 + $0xd48] sm:$0xff]  ;;  %v2267_v11 = vld [vmem:[#allocation2 + $0x50] sm:$0xff]  ;;  %v490_v14 = vld [vmem:[#allocation5 + $0xd40] sm:$0xff] }
 0x117   :  { %1748 = vmatpush1.bf16.msra.mxu1 %v1747_v27  ;;  %v608_v27 = vld [vmem:[#allocation5 + $0x10f0] sm:$0xff]  ;;  %v1921_v13 = vpack.c.bf16 %v497_v10, %v491_v9 }
 0x118   :  { %1876 = vmatpush1.bf16.msra.mxu0 %v1875_v29  ;;  %1750 = vmatprep.subr.bf16.mxu1 %v1749_v30  ;;  %v614_v29 = vld [vmem:[#allocation5 + $0x1120] sm:$0xff]  ;;  %v496_v15 = vld [vmem:[#allocation5 + $0xd70] sm:$0xff] }
 0x119   :  { %1878 = vmatprep.subr.bf16.mxu0 %v1877_v34  ;;  %v418_v30 = vld [vmem:[#allocation5 + $0xb00] sm:$0xff]  ;;  %v627_v34 = vld [vmem:[#allocation5 + $0x1188] sm:$0xff]  ;;  %v1771_v22 = vpack.c.bf16 %v614_v29, %v608_v27  ;;  %v508_v29 = vld [vmem:[#allocation5 + $0xdd0] sm:$0xff] }
 0x11a   :  { %v1899_v19 = vpack.c.bf16 %v424_v32, %v418_v30  ;;  %v1773_v16 = vpack.c.bf16 %v627_v34, %v621_v33  ;;  %v502_v27 = vld [vmem:[#allocation5 + $0xda0] sm:$0xff]  ;;  %v515_v30 = vld [vmem:[#allocation5 + $0xe08] sm:$0xff] }
 0x11b   :  { %1752 = vmatpush1.bf16.msra.mxu1 %v1751_v21  ;;  %v620_v21 = vld [vmem:[#allocation5 + $0x1150] sm:$0xff]  ;;  %v1927_v32 = vpack.c.bf16 %v508_v29, %v502_v27  ;;  %v514_v34 = vld [vmem:[#allocation5 + $0xe00] sm:$0xff] }
 0x11c   :  { %1880 = vmatpush1.bf16.msra.mxu0 %v1879_v28  ;;  %1754 = vmatprep.subr.bf16.mxu1 %v1753_v38  ;;  %v626_v28 = vld [vmem:[#allocation5 + $0x1180] sm:$0xff] }
 0x11d   :  { %1882 = vmatprep.subr.bf16.mxu0 %v1881_v41  ;;  %v430_v38 = vld [vmem:[#allocation5 + $0xb60] sm:$0xff]  ;;  %v639_v41 = vld [vmem:[#allocation5 + $0x11e8] sm:$0xff]  ;;  %v1775_v44 = vpack.c.bf16 %v626_v28, %v620_v21  ;;  %v532_v28 = vld [vmem:[#allocation5 + $0xe90] sm:$0xff] }
 0x11e   :  { %v1903_v45 = vpack.c.bf16 %v436_v39, %v430_v38  ;;  %v1777_v46 = vpack.c.bf16 %v639_v41, %v633_v40  ;;  %v526_v21 = vld [vmem:[#allocation5 + $0xe60] sm:$0xff]  ;;  %v545_v39 = vld [vmem:[#allocation5 + $0xef8] sm:$0xff] }
 0x11f   :  { %1756 = vmatpush1.bf16.msra.mxu1 %v1755_v47  ;;  %v632_v47 = vld [vmem:[#allocation5 + $0x11b0] sm:$0xff]  ;;  %v1935_v41 = vpack.c.bf16 %v532_v28, %v526_v21 }
 0x120   :  { %1884 = vmatpush1.bf16.msra.mxu0 %v1883_v48  ;;  %1758 = vmatprep.subr.bf16.mxu1 %v1757_v36  ;;  %v638_v48 = vld [vmem:[#allocation5 + $0x11e0] sm:$0xff] }
 0x121   :  { %1886 = vmatprep.subr.bf16.mxu0 %v1885_v52  ;;  %v442_v36 = vld [vmem:[#allocation5 + $0xbc0] sm:$0xff]  ;;  %v461_v52 = vld [vmem:[#allocation5 + $0xc58] sm:$0xff]  ;;  %v1779_v53 = vpack.c.bf16 %v638_v48, %v632_v47 }
 0x122   :  { %v1907_v54 = vpack.c.bf16 %v448_v50, %v442_v36  ;;  %v1909_v55 = vpack.c.bf16 %v461_v52, %v455_v51  ;;  %v550_v36 = vld [vmem:[#allocation5 + $0xf20] sm:$0xff]  ;;  %v563_v50 = vld [vmem:[#allocation5 + $0xf88] sm:$0xff]  ;;  %v569_v51 = vld [vmem:[#allocation5 + $0xfb8] sm:$0xff] }
 0x123   :  { %1760 = vmatpush1.bf16.msra.mxu1 %v1759_v58  ;;  %v467_v58 = vld [vmem:[#allocation5 + $0xc88] sm:$0xff] }
 0x124   :  { %1888 = vmatpush1.bf16.msra.mxu0 %v1887_v59  ;;  %1762 = vmatprep.subr.bf16.mxu1 %v1761_v60  ;;  %v473_v59 = vld [vmem:[#allocation5 + $0xcb8] sm:$0xff]  ;;  %v1911_v60 = vpack.c.bf16 %v460_v57, %v454_v56  ;;  %v575_v56 = vld [vmem:[#allocation5 + $0xfe8] sm:$0xff] }
 0x125   :  { %1890 = vmatprep.subr.bf16.mxu0 %v1889_v0  ;;  %v1913_v63 = vpack.c.bf16 %v473_v59, %v467_v58  ;;  %v479_v0 = vld [vmem:[#allocation5 + $0xce8] sm:$0xff]  ;;  %v581_v57 = vld [vmem:[#allocation5 + $0x1018] sm:$0xff] }
 0x126   :  { %v1917_v17 = vpack.c.bf16 %v485_v1, %v479_v0  ;;  %v1949_v59 = vpack.c.bf16 %v581_v57, %v575_v56 }
 0x127   :  { %1764 = vmatpush1.bf16.msra.mxu1 %v1763_v5  ;;  %v478_v5 = vld [vmem:[#allocation5 + $0xce0] sm:$0xff] }
 0x128   :  { %1892 = vmatpush1.bf16.msra.mxu0 %v1891_v6  ;;  %1766 = vmatprep.subr.bf16.mxu1 %v1765_v8  ;;  %v484_v6 = vld [vmem:[#allocation5 + $0xd10] sm:$0xff]  ;;  %v2052_v8 = vld [vmem:[#allocation2 + $0x48] sm:$0xff] }
 0x129   :  { %1894 = vmatprep.subr.bf16.mxu0 %v1893_v12  ;;  %v2054_v12 = vld [vmem:[#allocation2 + $0x40] sm:$0xff] }
 0x12b   :  { %1768 = vmatpush1.bf16.msra.mxu1 %v1767_v24  ;;  %v2055_v24 = vld [vmem:[#allocation2 + $0x28] sm:$0xff] }
 0x12c   :  { %1896 = vmatpush1.bf16.msra.mxu0 %v1895_v25  ;;  %1770 = vmatprep.subr.bf16.mxu1 %v1769_v26  ;;  %v1923_v25 = vpack.c.bf16 %v496_v15, %v490_v14  ;;  %v1925_v26 = vpack.c.bf16 %v509_v20, %v503_v18  ;;  %v617_v14 = vld [vmem:[#allocation5 + $0x1138] sm:$0xff]  ;;  %v610_v20 = vld [vmem:[#allocation5 + $0x1100] sm:$0xff] }
 0x12d   :  { %1898 = vmatprep.subr.bf16.mxu0 %v1897_v31  ;;  %v521_v31 = vld [vmem:[#allocation5 + $0xe38] sm:$0xff] }
 0x12e   :  { %v1929_v33 = vpack.c.bf16 %v521_v31, %v515_v30  ;;  %v622_v30 = vld [vmem:[#allocation5 + $0x1160] sm:$0xff]  ;;  %v628_v31 = vld [vmem:[#allocation5 + $0x1190] sm:$0xff] }
 0x12f   :  { %1772 = vmatpush1.bf16.msra.mxu1 %v1771_v22  ;;  %v533_v22 = vld [vmem:[#allocation5 + $0xe98] sm:$0xff] }
 0x130   :  { %1900 = vmatpush1.bf16.msra.mxu0 %v1899_v19  ;;  %1774 = vmatprep.subr.bf16.mxu1 %v1773_v16  ;;  %v1931_v19 = vpack.c.bf16 %v520_v35, %v514_v34  ;;  %v1933_v16 = vpack.c.bf16 %v533_v22, %v527_v37  ;;  %v1967_v34 = vpack.c.bf16 %v628_v31, %v622_v30  ;;  %v634_v37 = vld [vmem:[#allocation5 + $0x11c0] sm:$0xff]  ;;  %v640_v22 = vld [vmem:[#allocation5 + $0x11f0] sm:$0xff] }
 0x131   :  { %1902 = vmatprep.subr.bf16.mxu0 %v1901_v23  ;;  %v539_v23 = vld [vmem:[#allocation5 + $0xec8] sm:$0xff] }
 0x132   :  { %v1937_v42 = vpack.c.bf16 %v545_v39, %v539_v23  ;;  %v642_v23 = vld [vmem:[#allocation7] sm:$0x3f] }
 0x133   :  { %1776 = vmatpush1.bf16.msra.mxu1 %v1775_v44  ;;  %v544_v44 = vld [vmem:[#allocation5 + $0xef0] sm:$0xff] }
 0x134   :  { %1904 = vmatpush1.bf16.msra.mxu0 %v1903_v45  ;;  %1778 = vmatprep.subr.bf16.mxu1 %v1777_v46  ;;  %v551_v45 = vld [vmem:[#allocation5 + $0xf28] sm:$0xff]  ;;  %v557_v46 = vld [vmem:[#allocation5 + $0xf58] sm:$0xff]  ;;  %v1939_v47 = vpack.c.bf16 %v544_v44, %v538_v43 }
 0x135   :  { %1906 = vmatprep.subr.bf16.mxu0 %v1905_v49  ;;  %v1941_v48 = vpack.c.bf16 %v557_v46, %v551_v45  ;;  %v556_v49 = vld [vmem:[#allocation5 + $0xf50] sm:$0xff] }
 0x136   :  { %v1943_v52 = vpack.c.bf16 %v556_v49, %v550_v36 }
 0x137   :  { %1780 = vmatpush1.bf16.msra.mxu1 %v1779_v53  ;;  %v1945_v53 = vpack.c.bf16 %v569_v51, %v563_v50 }
 0x138   :  { %1908 = vmatpush1.bf16.msra.mxu0 %v1907_v54  ;;  %1973 = vmatprep.subr.bf16.mxu1 %v1909_v55  ;;  %v562_v54 = vld [vmem:[#allocation5 + $0xf80] sm:$0xff] }
 0x139   :  { %1910 = vmatprep.subr.bf16.mxu0 %v1909_v55  ;;  %v568_v55 = vld [vmem:[#allocation5 + $0xfb0] sm:$0xff] }
 0x13a   :  { %1124 = vmatmul.mubr.f32.vlgmr.msra.gmra.mrb[4].mxu1 %v2263_v2  ;;  %v1947_v58 = vpack.c.bf16 %v568_v55, %v562_v54 }
 0x13b   :  { %1278 = vmatmul.mubr.f32.vlgmr.msra.gmra.mrb[4].mxu0 %v2255_v7  ;;  %1989 = vmatpush1.bf16.msra.mxu1 %v1911_v60  ;;  %v1919_v7 = vpack.c.bf16 %v484_v6, %v478_v5  ;;  %v605_v5 = vld [vmem:[#allocation5 + $0x10d8] sm:$0xff] }
 0x13c   :  { %1912 = vmatpush1.bf16.msra.mxu0 %v1911_v60  ;;  %1129 = vmatprep.mubr.f32.mxu1 %v2051_v4  ;;  %v574_v60 = vld [vmem:[#allocation5 + $0xfe0] sm:$0xff] }
 0x13d   :  { %1283 = vmatprep.mubr.f32.mxu0 %v2052_v8  ;;  %1914 = vmatprep.subr.bf16.mxu0 %v1913_v63  ;;  %v1951_v0 = vpack.c.bf16 %v580_v61, %v574_v60 }
 0x13e   :  { %1130 = vmatmul.mubr.f32.gmra.mrb[6].mxu1 %v2267_v11  ;;  %1974 = vmatprep.subr.bf16.mxu1 %v1913_v63  ;;  %v593_v63 = vld [vmem:[#allocation5 + $0x1078] sm:$0xff] }
 0x13f   :  { %1284 = vmatmul.mubr.f32.gmra.mrb[6].mxu0 %v2054_v12  ;;  %1990 = vmatpush1.bf16.msra.mxu1 %v1915_v3  ;;  %v1953_v1 = vpack.c.bf16 %v593_v63, %v587_v62  ;;  %v598_v12 = vld [vmem:[#allocation5 + $0x10a0] sm:$0xff] }
 0x140   :  { %1916 = vmatpush1.bf16.msra.mxu0 %v1915_v3  ;;  %1975 = vmatprep.subr.bf16.mxu1 %v1917_v17  ;;  %v586_v3 = vld [vmem:[#allocation5 + $0x1040] sm:$0xff] }
 0x141   :  { %1918 = vmatprep.subr.bf16.mxu0 %v1917_v17  ;;  %1354 = vmatprep.mubr.f32.mxu0 %v2055_v24  ;;  %v599_v17 = vld [vmem:[#allocation5 + $0x10a8] sm:$0xff]  ;;  %v616_v24 = vld [vmem:[#allocation5 + $0x1130] sm:$0xff] }
 0x142   :  { %1360 = vmatprep.mubr.f32.mxu1 %v2051_v4  ;;  %v592_v4 = vld [vmem:[#allocation5 + $0x1070] sm:$0xff]  ;;  %v1957_v10 = vpack.c.bf16 %v605_v5, %v599_v17  ;;  %v1963_v27 = vpack.c.bf16 %v616_v24, %v610_v20 }
 0x143   :  { %1991 = vmatpush1.bf16.msra.mxu1 %v1919_v7  ;;  %v1955_v9 = vpack.c.bf16 %v592_v4, %v586_v3 }
 0x144   :  { %1920 = vmatpush1.bf16.msra.mxu0 %v1919_v7  ;;  %1976 = vmatprep.subr.bf16.mxu1 %v1921_v13  ;;  %v604_v7 = vld [vmem:[#allocation5 + $0x10d0] sm:$0xff] }
 0x145   :  { %1922 = vmatprep.subr.bf16.mxu0 %v1921_v13  ;;  %v611_v13 = vld [vmem:[#allocation5 + $0x1108] sm:$0xff]  ;;  %v1959_v15 = vpack.c.bf16 %v604_v7, %v598_v12 }
 0x146   :  { %v1961_v18 = vpack.c.bf16 %v617_v14, %v611_v13 }
 0x147   :  { %1992 = vmatpush1.bf16.msra.mxu1 %v1923_v25 }
 0x148   :  { %1924 = vmatpush1.bf16.msra.mxu0 %v1923_v25  ;;  %1977 = vmatprep.subr.bf16.mxu1 %v1925_v26  ;;  %v623_v25 = vld [vmem:[#allocation5 + $0x1168] sm:$0xff] }
 0x149   :  { %1926 = vmatprep.subr.bf16.mxu0 %v1925_v26  ;;  %v629_v26 = vld [vmem:[#allocation5 + $0x1198] sm:$0xff] }
 0x14a   :  { %v1965_v29 = vpack.c.bf16 %v629_v26, %v623_v25 }
 0x14b   :  { %1993 = vmatpush1.bf16.msra.mxu1 %v1927_v32 }
 0x14c   :  { %1928 = vmatpush1.bf16.msra.mxu0 %v1927_v32  ;;  %1978 = vmatprep.subr.bf16.mxu1 %v1929_v33  ;;  %v635_v32 = vld [vmem:[#allocation5 + $0x11c8] sm:$0xff] }
 0x14d   :  { %v2270_v38 = vpop.f32.mrb[0].mxu1  ;;  %1930 = vmatprep.subr.bf16.mxu0 %v1929_v33  ;;  %v641_v33 = vld [vmem:[#allocation5 + $0x11f8] sm:$0xff] }
 0x14e   :  { %v2272_v40 = vpop.f32.mrb[1].mxu1  ;;  %v1969_v35 = vpack.c.bf16 %v641_v33, %v635_v32 }
 0x14f   :  { %1994 = vmatpush1.bf16.msra.mxu1 %v1931_v19 }
 0x150   :  { %1932 = vmatpush1.bf16.msra.mxu0 %v1931_v19  ;;  %1979 = vmatprep.subr.bf16.mxu1 %v1933_v16  ;;  %v1971_v19 = vpack.c.bf16 %v640_v22, %v634_v37 }
 0x151   :  { %1934 = vmatprep.subr.bf16.mxu0 %v1933_v16  ;;  %v746_v6 = vpop.f32.mrb[2].mxu1  ;;  %v644_v16 = vlaneseq }
 0x152   :  { %v2274_v8 = vpop.f32.mrb[3].mxu1 }
 0x153   :  { %1995 = vmatpush1.bf16.msra.mxu1 %v1935_v41  ;;  %v645_v21 = vshrl.u32 %v644_v16, 7 }
 0x154   :  { %1936 = vmatpush1.bf16.msra.mxu0 %v1935_v41  ;;  %1980 = vmatprep.subr.bf16.mxu1 %v1937_v42 }
 0x155   :  { %1938 = vmatprep.subr.bf16.mxu0 %v1937_v42  ;;  %v646_v28 = vsub.s32 0, %v645_v21  ;;  %v650_v39 = vsub.s32 1, %v645_v21 }
 0x157   :  { %1996 = vmatpush1.bf16.msra.mxu1 %v1939_v47  ;;  %v647_v41 = vrot.slane %v642_v23, %v646_v28  ;;  %v651_v42 = vrot.slane %v642_v23, %v650_v39 }
 0x158   :  { %1940 = vmatpush1.bf16.msra.mxu0 %v1939_v47  ;;  %1981 = vmatprep.subr.bf16.mxu1 %v1941_v48 }
 0x159   :  { %1942 = vmatprep.subr.bf16.mxu0 %v1941_v48  ;;  %v741_v43 = vadd.f32 %v2270_v38, %v647_v41  ;;  %v743_v44 = vadd.f32 %v2272_v40, %v651_v42  ;;  %v747_v36 = vadd.f32 %v746_v6, %v647_v41 }
 0x15b   :  { %1997 = vmatpush1.bf16.msra.mxu1 %v1943_v52 }
 0x15c   :  { %1944 = vmatpush1.bf16.msra.mxu0 %v1943_v52  ;;  %1982 = vmatprep.subr.bf16.mxu1 %v1945_v53  ;;  %v654_v52 = vsub.s32 2, %v645_v21 }
 0x15d   :  { %1946 = vmatprep.subr.bf16.mxu0 %v1945_v53  ;;  %v658_v53 = vsub.s32 3, %v645_v21 }
 0x15e   :  { %v655_v38 = vrot.slane %v642_v23, %v654_v52 }
 0x15f   :  { %1998 = vmatpush1.bf16.msra.mxu1 %v1947_v58  ;;  %v659_v54 = vrot.slane %v642_v23, %v658_v53 }
 0x160   :  { %1948 = vmatpush1.bf16.msra.mxu0 %v1947_v58  ;;  %1983 = vmatprep.subr.bf16.mxu1 %v1949_v59 }
 0x161   :  { %1950 = vmatprep.subr.bf16.mxu0 %v1949_v59 }
 0x163   :  { %1999 = vmatpush1.bf16.msra.mxu1 %v1951_v0 }
 0x164   :  { %1952 = vmatpush1.bf16.msra.mxu0 %v1951_v0  ;;  %1984 = vmatprep.subr.bf16.mxu1 %v1953_v1  ;;  %v662_v0 = vsub.s32 4, %v645_v21 }
 0x165   :  { %1954 = vmatprep.subr.bf16.mxu0 %v1953_v1  ;;  %v666_v1 = vsub.s32 5, %v645_v21 }
 0x166   :  { %v663_v3 = vrot.slane %v642_v23, %v662_v0 }
 0x167   :  { %2000 = vmatpush1.bf16.msra.mxu1 %v1955_v9  ;;  %v667_v4 = vrot.slane %v642_v23, %v666_v1 }
 0x168   :  { %1956 = vmatpush1.bf16.msra.mxu0 %v1955_v9  ;;  %1985 = vmatprep.subr.bf16.mxu1 %v1957_v10 }
 0x169   :  { %1958 = vmatprep.subr.bf16.mxu0 %v1957_v10 }
 0x16b   :  { %2001 = vmatpush1.bf16.msra.mxu1 %v1959_v15 }
 0x16c   :  { %1960 = vmatpush1.bf16.msra.mxu0 %v1959_v15  ;;  %1986 = vmatprep.subr.bf16.mxu1 %v1961_v18 }
 0x16d   :  { %1962 = vmatprep.subr.bf16.mxu0 %v1961_v18 }
 0x16f   :  { %2002 = vmatpush1.bf16.msra.mxu1 %v1963_v27 }
 0x170   :  { %1964 = vmatpush1.bf16.msra.mxu0 %v1963_v27  ;;  %1987 = vmatprep.subr.bf16.mxu1 %v1965_v29 }
 0x171   :  { %1966 = vmatprep.subr.bf16.mxu0 %v1965_v29 }
 0x173   :  { %2003 = vmatpush1.bf16.msra.mxu1 %v1967_v34 }
 0x174   :  { %1968 = vmatpush1.bf16.msra.mxu0 %v1967_v34  ;;  %1988 = vmatprep.subr.bf16.mxu1 %v1969_v35 }
 0x175   :  { %1970 = vmatprep.subr.bf16.mxu0 %v1969_v35 }
 0x177   :  { %2004 = vmatpush1.bf16.msra.mxu1 %v1971_v19 }
 0x178   :  { %1972 = vmatpush1.bf16.msra.mxu0 %v1971_v19 }
 0x17a   :  { %1361 = vmatmul.mubr.f32.vlgmr.msra.gmra.mrb[8].mxu1 %v2267_v11  ;;  %v749_v11 = vadd.f32 %v2274_v8, %v651_v42 }
 0x17b   :  { %1355 = vmatmul.mubr.f32.vlgmr.msra.gmra.mrb[4].mxu0 %v2263_v2 }
 0x18e   :  { %v894_v45 = vpop.f32.mrb[0].mxu0 }
 0x18f   :  { %v2006_v46 = vadd.f32 %v894_v45, %v741_v43  ;;  %v896_v47 = vpop.f32.mrb[1].mxu0 }
 0x190   :  { %v2008_v48 = vadd.f32 %v896_v47, %v743_v44 }
 0x191   :  { %1367 = vst [vmem:[#allocation8] sm:$0xff] %v2006_v46 }
 0x192   :  { %1368 = vst [vmem:[#allocation8 + $0x8] sm:$0xff] %v2008_v48  ;;  %v900_v2 = vpop.f32.mrb[2].mxu0 }
 0x193   :  { %v2010_v49 = vadd.f32 %v900_v2, %v747_v36  ;;  %v902_v50 = vpop.f32.mrb[3].mxu0 }
 0x194   :  { %v2012_v51 = vadd.f32 %v902_v50, %v749_v11 }
 0x195   :  { %1373 = vst [vmem:[#allocation8 + $0x30] sm:$0xff] %v2010_v49 }
 0x196   :  { %1374 = vst [vmem:[#allocation8 + $0x38] sm:$0xff] %v2012_v51 }
 0x20d   :  { %v1125_v40 = vpop.f32.mrb[4].mxu1 }
 0x20e   :  { %v2013_v55 = vadd.f32 %v1125_v40, %v655_v38  ;;  %v1127_v56 = vpop.f32.mrb[5].mxu1 }
 0x20f   :  { %v2014_v57 = vadd.f32 %v1127_v56, %v659_v54 }
 0x210   :  { %1369 = vst [vmem:[#allocation8 + $0x10] sm:$0xff] %v2013_v55 }
 0x211   :  { %1370 = vst [vmem:[#allocation8 + $0x18] sm:$0xff] %v2014_v57  ;;  %v1131_v58 = vpop.f32.mrb[6].mxu1 }
 0x212   :  { %v2015_v59 = vadd.f32 %v1131_v58, %v655_v38  ;;  %v1285_v60 = vpop.f32.mrb[6].mxu0  ;;  %v1133_v61 = vpop.f32.mrb[7].mxu1 }
 0x213   :  { %v2016_v62 = vadd.f32 %v1133_v61, %v659_v54  ;;  %v1287_v63 = vpop.f32.mrb[7].mxu0  ;;  %v2019_v17 = vadd.f32 %v1285_v60, %v663_v3 }
 0x214   :  { %1375 = vst [vmem:[#allocation8 + $0x40] sm:$0xff] %v2015_v59  ;;  %v2021_v5 = vadd.f32 %v1287_v63, %v667_v4 }
 0x215   :  { %1376 = vst [vmem:[#allocation8 + $0x48] sm:$0xff] %v2016_v62 }
 0x24d   :  { %v1362_v6 = vpop.f32.mrb[8].mxu1 }
 0x24e   :  { %v1356_v8 = vpop.f32.mrb[4].mxu0  ;;  %v2020_v9 = vadd.f32 %v2019_v17, %v1362_v6  ;;  %v1364_v10 = vpop.f32.mrb[9].mxu1 }
 0x24f   :  { %v2017_v12 = vadd.f32 %v1356_v8, %v663_v3  ;;  %v1358_v7 = vpop.f32.mrb[5].mxu0  ;;  %v2022_v13 = vadd.f32 %v2021_v5, %v1364_v10 }
 0x250   :  { %1377 = vst [vmem:[#allocation8 + $0x50] sm:$0xff] %v2020_v9  ;;  %v2018_v14 = vadd.f32 %v1358_v7, %v667_v4 }
 0x251   :  { %1371 = vst [vmem:[#allocation8 + $0x20] sm:$0xff] %v2017_v12  ;;  %1378 = vst [vmem:[#allocation8 + $0x58] sm:$0xff] %v2022_v13 }
 0x252   :  { %1372 = vst [vmem:[#allocation8 + $0x28] sm:$0xff] %v2018_v14 }
 0x253   :  { %2133 = shalt.err (!%p2130_p0)
}
 0x254   :  { %s2134_s27 = scalar_lea.hbm %s2299_s3, 1536 }
 0x255   :  { %p2135_p1 = scmp.ne.s32.totalorder %s2299_s3, %s2134_s27  ;;  %p2138_p2 = scmp.lt.u32.totalorder %s2134_s27, %s2299_s3 }
 0x257   :  { %p2140_p3 = pnand %p2138_p2, %p2135_p1 }
 0x259   :  { %2143 = shalt.err (!%p2140_p3)
}
 0x25a   :  { %1390 = dma.vmem_to_hbm [thread:$0]  %s1385_s21, 1536, %s2299_s3, [#allocation4], %s2152_s24, %s2152_s24, %s2153_s25  }
 0x25b   :  { %2148 = dma.done.wait [#allocation4], 1536  }
 0x25c   :  { %2149 = vsyncadd [#allocation4], 4294965760 }
 0x25d   :  { %1394 = vsyncpa [#allocation3], 1 }
 0x25e   :  { %1395 = vsyncpa [#allocation6], 1 }
 0x25f   :  { %1396 = vsyncpa [#allocation4], 1 }

</bundles_post_ra>
